<compile_context>
chip_gen: v6e
topology: v6e:2x2x1
jax: 0.10.0
libtpu: 0.0.40
codegen_flags: <defaults>
</compile_context>

<pallas_src>
import math
import jax
import jax.numpy as jnp
from jax.experimental import pallas as pl
from jax.experimental.pallas import tpu as pltpu


def _sigh_vae_kernel(x_ref, w1_ref, b1_ref, wt_ref, bt_ref, wcat_ref, bcat_ref,
                     eps_ref, x_out_ref, mu_ref, var_ref, z_ref, acc_ref):
    """grid = (batch_tile, k_tile); k (axis 1) is the fc1 contraction axis."""
    k = pl.program_id(1)

    @pl.when(k == 0)
    def _init():
        acc_ref[...] = jnp.zeros_like(acc_ref)

    # fc1 partial product for this K-chunk: bf16 x bf16 -> f32 accumulate.
    acc_ref[...] += jnp.dot(x_ref[...], w1_ref[...],
                            preferred_element_type=jnp.float32)

    @pl.when(k == pl.num_programs(1) - 1)
    def _epilogue():
        # fc1 bias + relu
        h1 = jnp.maximum(acc_ref[...] + b1_ref[...], 0.0)
        # fc_trans + relu   (cast activation to bf16 for the MXU, accumulate f32)
        x = jnp.dot(h1.astype(wt_ref.dtype), wt_ref[...],
                    preferred_element_type=jnp.float32) + bt_ref[...]
        x = jnp.maximum(x, 0.0)
        # fused mu/var heads: one [H, 2V] matmul, then slice.
        hv = jnp.dot(x.astype(wcat_ref.dtype), wcat_ref[...],
                     preferred_element_type=jnp.float32) + bcat_ref[...]
        v = mu_ref.shape[1]
        mu = hv[:, :v]
        var = hv[:, v:]
        # reparameterize (training=True): z = eps * exp(var) + mu   (f32 exp)
        z = eps_ref[...] * jnp.exp(var) + mu

        x_out_ref[...] = x
        mu_ref[...] = mu
        var_ref[...] = var
        z_ref[...] = z


def sigh_vae_forward(x_bow, params, eps, *, tb=128, tk=512):
    """x_bow: [B, num_words] (any float dtype); eps: [B, vae_mid] f32 N(0,1) noise.

    Returns (x, mu, var, z), all f32, matching the PyTorch module outputs.
    """
    B, NW = x_bow.shape
    H = params["w1"].shape[1]
    V = params["wcat"].shape[1] // 2

    # Pad batch / vocab up to tile multiples (zero padding is exact for the dot).
    Bp = ((B + tb - 1) // tb) * tb
    NWp = ((NW + tk - 1) // tk) * tk

    x_pad = jnp.zeros((Bp, NWp), jnp.bfloat16)
    x_pad = x_pad.at[:B, :NW].set(x_bow.astype(jnp.bfloat16))
    w1 = params["w1"]
    if NWp != NW:
        w1 = jnp.zeros((NWp, H), w1.dtype).at[:NW, :].set(w1)
    eps_pad = jnp.zeros((Bp, V), jnp.float32).at[:B, :].set(eps.astype(jnp.float32))

    grid = (Bp // tb, NWp // tk)

    out_shapes = (
        jax.ShapeDtypeStruct((Bp, H), jnp.float32),  # x (bow encoding)
        jax.ShapeDtypeStruct((Bp, V), jnp.float32),  # mu
        jax.ShapeDtypeStruct((Bp, V), jnp.float32),  # var
        jax.ShapeDtypeStruct((Bp, V), jnp.float32),  # z
    )

    full = lambda shape: pl.BlockSpec(shape, lambda bi, ki: (0, 0))
    batch_blk = lambda cols: pl.BlockSpec((tb, cols), lambda bi, ki: (bi, 0))

    x_out, mu, var, z = pl.pallas_call(
        _sigh_vae_kernel,
        out_shape=out_shapes,
        grid=grid,
        in_specs=[
            pl.BlockSpec((tb, tk), lambda bi, ki: (bi, ki)),  # x_bow tile
            pl.BlockSpec((tk, H), lambda bi, ki: (ki, 0)),    # W1 K-chunk (streamed)
            full((1, H)),                                      # b1
            full((H, H)),                                      # Wt
            full((1, H)),                                      # bt
            full((H, 2 * V)),                                  # Wcat (fused heads)
            full((1, 2 * V)),                                  # bcat
            batch_blk(V),                                      # eps
        ],
        out_specs=[
            batch_blk(H),   # x
            batch_blk(V),   # mu
            batch_blk(V),   # var
            batch_blk(V),   # z
        ],
        scratch_shapes=[pltpu.VMEM((tb, H), jnp.float32)],     # fc1 accumulator
        compiler_params=pltpu.CompilerParams(
            dimension_semantics=("parallel", "arbitrary"),
            vmem_limit_bytes=32 * 1024 * 1024,
        ),
    )(x_pad, w1, params["b1"], params["wt"], params["bt"],
      params["wcat"], params["bcat"], eps_pad)

    return x_out[:B], mu[:B], var[:B], z[:B]


def init_params(key, num_words, bow_mid_hid, vae_mid):
    """Parameter init mirroring the PyTorch module (weights stored [in, out]).
    Matmul weights are kept in bf16; biases in f32; mu/var heads pre-concatenated."""
    ks = jax.random.split(key, 8)

    def kaiming(k, fan_in, shape):       # kaiming_normal_, fan_in mode, gain sqrt(2)
        return jax.random.normal(k, shape, jnp.float32) * math.sqrt(2.0 / fan_in)

    def default_lin(k, fan_in, shape):   # nn.Linear default U(-1/sqrt(fan_in), ..)
        bound = 1.0 / math.sqrt(fan_in)
        return jax.random.uniform(k, shape, jnp.float32, -bound, bound)

    w1 = kaiming(ks[0], num_words, (num_words, bow_mid_hid))
    b1 = default_lin(ks[1], num_words, (1, bow_mid_hid))
    wt = kaiming(ks[2], bow_mid_hid, (bow_mid_hid, bow_mid_hid))
    bt = default_lin(ks[3], bow_mid_hid, (1, bow_mid_hid))
    wmu = default_lin(ks[4], bow_mid_hid, (bow_mid_hid, vae_mid))
    bmu = default_lin(ks[5], bow_mid_hid, (1, vae_mid))
    wvar = default_lin(ks[6], bow_mid_hid, (bow_mid_hid, vae_mid))
    bvar = default_lin(ks[7], bow_mid_hid, (1, vae_mid))

    return {
        "w1": w1.astype(jnp.bfloat16),
        "b1": b1,
        "wt": wt.astype(jnp.bfloat16),
        "bt": bt,
        "wcat": jnp.concatenate([wmu, wvar], axis=1).astype(jnp.bfloat16),  # [H, 2V]
        "bcat": jnp.concatenate([bmu, bvar], axis=1),                        # [1, 2V]
    }


def _reference(x_bow, params, eps):
    """Pure-JAX reference with the same dtype handling as the kernel
    (bf16 operands, f32 accumulation / biases / elementwise)."""
    xb = x_bow.astype(jnp.bfloat16)
    h1 = jnp.dot(xb, params["w1"], preferred_element_type=jnp.float32) + params["b1"]
    h1 = jnp.maximum(h1, 0.0)
    x = jnp.dot(h1.astype(jnp.bfloat16), params["wt"],
                preferred_element_type=jnp.float32) + params["bt"]
    x = jnp.maximum(x, 0.0)
    hv = jnp.dot(x.astype(jnp.bfloat16), params["wcat"],
                 preferred_element_type=jnp.float32) + params["bcat"]
    V = params["bcat"].shape[1] // 2
    mu, var = hv[:, :V], hv[:, V:]
    z = eps * jnp.exp(var) + mu
    return x, mu, var, z


if __name__ == "__main__":
    # Small-but-representative shapes: batch padded to a full MXU tile multiple,
    # vocab large enough to exercise the K-tiled fc1 pipeline (grid = (2, 4)).
    B, NUM_WORDS, BOW_MID_HID, VAE_MID = 256, 2048, 128, 128

    key = jax.random.PRNGKey(0)
    k_param, k_x, k_eps = jax.random.split(key, 3)

    params = init_params(k_param, NUM_WORDS, BOW_MID_HID, VAE_MID)
    x_bow = jax.random.uniform(k_x, (B, NUM_WORDS), jnp.float32)
    # eps ~ N(0,1), generated host-side and passed in (torch.randn_like equivalent).
    eps = jax.random.normal(k_eps, (B, VAE_MID), jnp.float32)

    x, mu, var, z = sigh_vae_forward(x_bow, params, eps, tb=128, tk=512)
    jax.block_until_ready((x, mu, var, z))

    # sanity check vs pure-JAX reference (same bf16/f32 mixed precision)
    xr, mur, varr, zr = _reference(x_bow, params, eps)
    assert jnp.allclose(x, xr, atol=1e-2, rtol=1e-2)
    assert jnp.allclose(mu, mur, atol=1e-2, rtol=1e-2)
    assert jnp.allclose(var, varr, atol=1e-2, rtol=1e-2)
    assert jnp.allclose(z, zr, atol=1e-2, rtol=1e-2)

    print("KERNEL_OK")
</pallas_src>

<mosaic_0001>
module attributes {stable_mosaic.version = 11 : i64} {
  func.func @_sigh_vae_kernel(%arg0: i32, %arg1: i32, %arg2: memref<128x512xbf16, #tpu.memory_space<vmem>>, %arg3: memref<512x128xbf16, #tpu.memory_space<vmem>>, %arg4: memref<1x128xf32, #tpu.memory_space<vmem>>, %arg5: memref<128x128xbf16, #tpu.memory_space<vmem>>, %arg6: memref<1x128xf32, #tpu.memory_space<vmem>>, %arg7: memref<128x256xbf16, #tpu.memory_space<vmem>>, %arg8: memref<1x256xf32, #tpu.memory_space<vmem>>, %arg9: memref<128x128xf32, #tpu.memory_space<vmem>>, %arg10: memref<128x128xf32, #tpu.memory_space<vmem>>, %arg11: memref<128x128xf32, #tpu.memory_space<vmem>>, %arg12: memref<128x128xf32, #tpu.memory_space<vmem>>, %arg13: memref<128x128xf32, #tpu.memory_space<vmem>>, %arg14: memref<128x128xf32, #tpu.memory_space<vmem>>) attributes {dimension_semantics = [#tpu.dimension_semantics<parallel>, #tpu.dimension_semantics<arbitrary>], iteration_bounds = array<i64: 2, 4>, scalar_prefetch = 0 : i64, scratch_operands = 1 : i64, tpu.core_type = #tpu.core_type<tc>, window_params = [{transform_indices = @transform_0, window_bounds = array<i64: 128, 512>}, {transform_indices = @transform_1, window_bounds = array<i64: 512, 128>}, {pipeline_mode = #tpu.pipeline_mode<synchronous>, transform_indices = @transform_2, window_bounds = array<i64: 1, 128>}, {pipeline_mode = #tpu.pipeline_mode<synchronous>, transform_indices = @transform_3, window_bounds = array<i64: 128, 128>}, {pipeline_mode = #tpu.pipeline_mode<synchronous>, transform_indices = @transform_4, window_bounds = array<i64: 1, 128>}, {pipeline_mode = #tpu.pipeline_mode<synchronous>, transform_indices = @transform_5, window_bounds = array<i64: 128, 256>}, {pipeline_mode = #tpu.pipeline_mode<synchronous>, transform_indices = @transform_6, window_bounds = array<i64: 1, 256>}, {transform_indices = @transform_7, window_bounds = array<i64: 128, 128>}, {transform_indices = @transform_8, window_bounds = array<i64: 128, 128>}, {transform_indices = @transform_9, window_bounds = array<i64: 128, 128>}, {transform_indices = @transform_10, window_bounds = array<i64: 128, 128>}, {transform_indices = @transform_11, window_bounds = array<i64: 128, 128>}]} {
    %c0_i32 = arith.constant 0 : i32
    %0 = arith.cmpi eq, %arg1, %c0_i32 : i32
    %1 = arith.extui %0 : i1 to i32
    %c0_i32_0 = arith.constant 0 : i32
    %2 = arith.cmpi ne, %1, %c0_i32_0 : i32
    scf.if %2 {
      %cst_9 = arith.constant 0.000000e+00 : f32
      %12 = vector.broadcast %cst_9 : f32 to vector<128x128xf32>
      %c0_10 = arith.constant 0 : index
      %c0_11 = arith.constant 0 : index
      %13 = vector.load %arg14[%c0_10, %c0_11] : memref<128x128xf32, #tpu.memory_space<vmem>>, vector<128x128xf32>
      tpu.vector_store %arg14[%c0_10, %c0_11], %12 {strides = array<i32>} : memref<128x128xf32, #tpu.memory_space<vmem>>, vector<128x128xf32>,
    } else {
    }
    %c0 = arith.constant 0 : index
    %c0_1 = arith.constant 0 : index
    %3 = vector.load %arg14[%c0, %c0_1] : memref<128x128xf32, #tpu.memory_space<vmem>>, vector<128x128xf32>
    %c0_2 = arith.constant 0 : index
    %c0_3 = arith.constant 0 : index
    %4 = vector.load %arg2[%c0_2, %c0_3] : memref<128x512xbf16, #tpu.memory_space<vmem>>, vector<128x512xbf16>
    %c0_4 = arith.constant 0 : index
    %c0_5 = arith.constant 0 : index
    %5 = vector.load %arg3[%c0_4, %c0_5] : memref<512x128xbf16, #tpu.memory_space<vmem>>, vector<512x128xbf16>
    %cst = arith.constant dense<0.000000e+00> : vector<128x128xf32>
    %6 = tpu.matmul %4, %5, %cst {dimension_numbers = #tpu.dot_dimension_numbers<[1], [0], [0], [1], [0, 0, 1, 1], [], []>} : vector<128x512xbf16>, vector<512x128xbf16>, vector<128x128xf32> -> vector<128x128xf32>
    %7 = arith.addf %3, %6 : vector<128x128xf32>
    %c0_6 = arith.constant 0 : index
    %c0_7 = arith.constant 0 : index
    %8 = vector.load %arg14[%c0_6, %c0_7] : memref<128x128xf32, #tpu.memory_space<vmem>>, vector<128x128xf32>
    tpu.vector_store %arg14[%c0_6, %c0_7], %7 {strides = array<i32>} : memref<128x128xf32, #tpu.memory_space<vmem>>, vector<128x128xf32>,
    %c3_i32 = arith.constant 3 : i32
    %9 = arith.cmpi eq, %arg1, %c3_i32 : i32
    %10 = arith.extui %9 : i1 to i32
    %c0_i32_8 = arith.constant 0 : i32
    %11 = arith.cmpi ne, %10, %c0_i32_8 : i32
    scf.if %11 {
      %c0_9 = arith.constant 0 : index
      %c0_10 = arith.constant 0 : index
      %12 = vector.load %arg14[%c0_9, %c0_10] : memref<128x128xf32, #tpu.memory_space<vmem>>, vector<128x128xf32>
      %c0_11 = arith.constant 0 : index
      %c0_12 = arith.constant 0 : index
      %13 = vector.load %arg4[%c0_11, %c0_12] : memref<1x128xf32, #tpu.memory_space<vmem>>, vector<1x128xf32>
      %14 = vector.broadcast %13 : vector<1x128xf32> to vector<128x128xf32>
      %15 = arith.addf %12, %14 : vector<128x128xf32>
      %cst_13 = arith.constant 0.000000e+00 : f32
      %16 = vector.broadcast %cst_13 : f32 to vector<128x128xf32>
      %17 = arith.maximumf %15, %16 : vector<128x128xf32>
      %18 = arith.truncf %17 : vector<128x128xf32> to vector<128x128xbf16>
      %c0_14 = arith.constant 0 : index
      %c0_15 = arith.constant 0 : index
      %19 = vector.load %arg5[%c0_14, %c0_15] : memref<128x128xbf16, #tpu.memory_space<vmem>>, vector<128x128xbf16>
      %cst_16 = arith.constant dense<0.000000e+00> : vector<128x128xf32>
      %20 = tpu.matmul %18, %19, %cst_16 {dimension_numbers = #tpu.dot_dimension_numbers<[1], [0], [0], [1], [0, 0, 1, 1], [], []>} : vector<128x128xbf16>, vector<128x128xbf16>, vector<128x128xf32> -> vector<128x128xf32>
      %c0_17 = arith.constant 0 : index
      %c0_18 = arith.constant 0 : index
      %21 = vector.load %arg6[%c0_17, %c0_18] : memref<1x128xf32, #tpu.memory_space<vmem>>, vector<1x128xf32>
      %22 = vector.broadcast %21 : vector<1x128xf32> to vector<128x128xf32>
      %23 = arith.addf %20, %22 : vector<128x128xf32>
      %cst_19 = arith.constant 0.000000e+00 : f32
      %24 = vector.broadcast %cst_19 : f32 to vector<128x128xf32>
      %25 = arith.maximumf %23, %24 : vector<128x128xf32>
      %26 = arith.truncf %25 : vector<128x128xf32> to vector<128x128xbf16>
      %c0_20 = arith.constant 0 : index
      %c0_21 = arith.constant 0 : index
      %27 = vector.load %arg7[%c0_20, %c0_21] : memref<128x256xbf16, #tpu.memory_space<vmem>>, vector<128x256xbf16>
      %cst_22 = arith.constant dense<0.000000e+00> : vector<128x256xf32>
      %28 = tpu.matmul %26, %27, %cst_22 {dimension_numbers = #tpu.dot_dimension_numbers<[1], [0], [0], [1], [0, 0, 1, 1], [], []>} : vector<128x128xbf16>, vector<128x256xbf16>, vector<128x256xf32> -> vector<128x256xf32>
      %c0_23 = arith.constant 0 : index
      %c0_24 = arith.constant 0 : index
      %29 = vector.load %arg8[%c0_23, %c0_24] : memref<1x256xf32, #tpu.memory_space<vmem>>, vector<1x256xf32>
      %30 = vector.broadcast %29 : vector<1x256xf32> to vector<128x256xf32>
      %31 = arith.addf %28, %30 : vector<128x256xf32>
      %32 = vector.extract_strided_slice %31 {offsets = [0, 0], sizes = [128, 128], strides = [1, 1]} : vector<128x256xf32> to vector<128x128xf32>
      %33 = vector.extract_strided_slice %31 {offsets = [0, 128], sizes = [128, 128], strides = [1, 1]} : vector<128x256xf32> to vector<128x128xf32>
      %c0_25 = arith.constant 0 : index
      %c0_26 = arith.constant 0 : index
      %34 = vector.load %arg9[%c0_25, %c0_26] : memref<128x128xf32, #tpu.memory_space<vmem>>, vector<128x128xf32>
      %35 = math.exp %33 : vector<128x128xf32>
      %36 = arith.mulf %34, %35 : vector<128x128xf32>
      %37 = arith.addf %36, %32 : vector<128x128xf32>
      %c0_27 = arith.constant 0 : index
      %c0_28 = arith.constant 0 : index
      %38 = vector.load %arg10[%c0_27, %c0_28] : memref<128x128xf32, #tpu.memory_space<vmem>>, vector<128x128xf32>
      tpu.vector_store %arg10[%c0_27, %c0_28], %25 {strides = array<i32>} : memref<128x128xf32, #tpu.memory_space<vmem>>, vector<128x128xf32>,
      %c0_29 = arith.constant 0 : index
      %c0_30 = arith.constant 0 : index
      %39 = vector.load %arg11[%c0_29, %c0_30] : memref<128x128xf32, #tpu.memory_space<vmem>>, vector<128x128xf32>
      tpu.vector_store %arg11[%c0_29, %c0_30], %32 {strides = array<i32>} : memref<128x128xf32, #tpu.memory_space<vmem>>, vector<128x128xf32>,
      %c0_31 = arith.constant 0 : index
      %c0_32 = arith.constant 0 : index
      %40 = vector.load %arg12[%c0_31, %c0_32] : memref<128x128xf32, #tpu.memory_space<vmem>>, vector<128x128xf32>
      tpu.vector_store %arg12[%c0_31, %c0_32], %33 {strides = array<i32>} : memref<128x128xf32, #tpu.memory_space<vmem>>, vector<128x128xf32>,
      %c0_33 = arith.constant 0 : index
      %c0_34 = arith.constant 0 : index
      %41 = vector.load %arg13[%c0_33, %c0_34] : memref<128x128xf32, #tpu.memory_space<vmem>>, vector<128x128xf32>
      tpu.vector_store %arg13[%c0_33, %c0_34], %37 {strides = array<i32>} : memref<128x128xf32, #tpu.memory_space<vmem>>, vector<128x128xf32>,
    } else {
    }
    return
  }
  func.func @transform_0(%arg0: i32, %arg1: i32) -> (i32, i32) {
    %c0_i32 = arith.constant 0 : i32
    return %arg0, %arg1 : i32, i32
  }
  func.func @transform_1(%arg0: i32, %arg1: i32) -> (i32, i32) {
    %c0_i32 = arith.constant 0 : i32
    %c0_i32_0 = arith.constant 0 : i32
    return %arg1, %c0_i32 : i32, i32
  }
  func.func @transform_2(%arg0: i32, %arg1: i32) -> (i32, i32) {
    %c0_i32 = arith.constant 0 : i32
    %c0_i32_0 = arith.constant 0 : i32
    %c0_i32_1 = arith.constant 0 : i32
    return %c0_i32, %c0_i32_0 : i32, i32
  }
  func.func @transform_3(%arg0: i32, %arg1: i32) -> (i32, i32) {
    %c0_i32 = arith.constant 0 : i32
    %c0_i32_0 = arith.constant 0 : i32
    %c0_i32_1 = arith.constant 0 : i32
    return %c0_i32, %c0_i32_0 : i32, i32
  }
  func.func @transform_4(%arg0: i32, %arg1: i32) -> (i32, i32) {
    %c0_i32 = arith.constant 0 : i32
    %c0_i32_0 = arith.constant 0 : i32
    %c0_i32_1 = arith.constant 0 : i32
    return %c0_i32, %c0_i32_0 : i32, i32
  }
  func.func @transform_5(%arg0: i32, %arg1: i32) -> (i32, i32) {
    %c0_i32 = arith.constant 0 : i32
    %c0_i32_0 = arith.constant 0 : i32
    %c0_i32_1 = arith.constant 0 : i32
    return %c0_i32, %c0_i32_0 : i32, i32
  }
  func.func @transform_6(%arg0: i32, %arg1: i32) -> (i32, i32) {
    %c0_i32 = arith.constant 0 : i32
    %c0_i32_0 = arith.constant 0 : i32
    %c0_i32_1 = arith.constant 0 : i32
    return %c0_i32, %c0_i32_0 : i32, i32
  }
  func.func @transform_7(%arg0: i32, %arg1: i32) -> (i32, i32) {
    %c0_i32 = arith.constant 0 : i32
    %c0_i32_0 = arith.constant 0 : i32
    return %arg0, %c0_i32 : i32, i32
  }
  func.func @transform_8(%arg0: i32, %arg1: i32) -> (i32, i32) {
    %c0_i32 = arith.constant 0 : i32
    %c0_i32_0 = arith.constant 0 : i32
    return %arg0, %c0_i32 : i32, i32
  }
  func.func @transform_9(%arg0: i32, %arg1: i32) -> (i32, i32) {
    %c0_i32 = arith.constant 0 : i32
    %c0_i32_0 = arith.constant 0 : i32
    return %arg0, %c0_i32 : i32, i32
  }
  func.func @transform_10(%arg0: i32, %arg1: i32) -> (i32, i32) {
    %c0_i32 = arith.constant 0 : i32
    %c0_i32_0 = arith.constant 0 : i32
    return %arg0, %c0_i32 : i32, i32
  }
  func.func @transform_11(%arg0: i32, %arg1: i32) -> (i32, i32) {
    %c0_i32 = arith.constant 0 : i32
    %c0_i32_0 = arith.constant 0 : i32
    return %arg0, %c0_i32 : i32, i32
  }
}

</mosaic_0001>

<bundles_post_ra>
// kernel: tpu_custom_call.1
= control target key start
LH: loop header
LB: loop body
LE: loop exit
PB: predicated region body
PF: predicated region fallthrough
CT: control target
= control target key end

     0   :  { %s4125_s0 = inlined_call_operand.hbm [shape: bf16[256,2048], index: 0, kind: input, shape index: {}]   ;;  %s4126_s1 = inlined_call_operand.hbm [shape: bf16[2048,128], index: 1, kind: input, shape index: {}]   ;;  %s4127_s2 = inlined_call_operand.vmem [shape: f32[1,128], index: 2, kind: input, shape index: {}]   ;;  %s4128_s3 = inlined_call_operand.hbm [shape: bf16[128,128], index: 3, kind: input, shape index: {}]   ;;  %s4129_s4 = inlined_call_operand.vmem [shape: f32[1,128], index: 4, kind: input, shape index: {}]   ;;  %s4130_s5 = inlined_call_operand.hbm [shape: bf16[128,256], index: 5, kind: input, shape index: {}]   ;;  %s4131_s6 = inlined_call_operand.vmem [shape: f32[1,256], index: 6, kind: input, shape index: {}]   ;;  %s4132_s7 = inlined_call_operand.hbm [shape: f32[256,128], index: 7, kind: input, shape index: {}]   ;;  %s4133_s8 = inlined_call_operand.hbm [shape: f32[256,128], index: 8, kind: output, shape index: {0}]   ;;  %s4134_s9 = inlined_call_operand.hbm [shape: f32[256,128], index: 9, kind: output, shape index: {1}]   ;;  %s4135_s10 = inlined_call_operand.hbm [shape: f32[256,128], index: 10, kind: output, shape index: {2}]   ;;  %s4136_s11 = inlined_call_operand.hbm [shape: f32[256,128], index: 11, kind: output, shape index: {3}]  }
   0x1   :  { %4161 = sst [smem:[#allocation38_spill]] %s4125_s0 }
   0x2   :  { %4162 = sst [smem:[#allocation39_spill]] %s4126_s1 }
   0x3   :  { %4163 = sst [smem:[#allocation40_spill]] %s4127_s2 }
   0x4   :  { %4164 = sst [smem:[#allocation41_spill]] %s4128_s3 }
   0x5   :  { %4165 = sst [smem:[#allocation42_spill]] %s4129_s4 }
   0x6   :  { %4166 = sst [smem:[#allocation43_spill]] %s4130_s5 }
   0x7   :  { %4167 = sst [smem:[#allocation44_spill]] %s4131_s6 }
   0x8   :  { %4168 = sst [smem:[#allocation45_spill]] %s4132_s7 }
   0x9   :  { %4169 = sst [smem:[#allocation46_spill]] %s4133_s8 }
   0xa   :  { %4170 = sst [smem:[#allocation47_spill]] %s4134_s9 }
   0xb   :  { %4171 = sst [smem:[#allocation48_spill]] %s4135_s10 }
   0xc   :  { %4172 = sst [smem:[#allocation49_spill]] %s4136_s11 }
   0xd   :  { %17 = vsyncpa [#allocation4], 0 }
   0xe   :  { %19 = vsyncpa [#allocation4 + $0x1], 0 }
   0xf   :  { %20 = vsyncpa [#allocation7], 0 }
  0x10   :  { %22 = vsyncpa [#allocation7 + $0x1], 0 }
  0x11   :  { %23 = vsyncpa [#allocation10], 0 }
  0x12   :  { %24 = vsyncpa [#allocation5], 0 }
  0x13   :  { %26 = vsyncpa [#allocation5 + $0x1], 0 }
  0x14   :  { %27 = vsyncpa [#allocation14], 0 }
  0x15   :  { %29 = vsyncpa [#allocation14 + $0x1], 0 }
  0x16   :  { %30 = vsyncpa [#allocation17], 0 }
  0x17   :  { %32 = vsyncpa [#allocation17 + $0x1], 0  ;;  %s3341_s17 = smov 0   ;;  %s3343_s18 = smov 0  }
  0x18   :  { %s3345_s19 = smov 0   ;;  %s3347_s20 = smov 0  }
  0x19   :  { %s3349_s21 = smov 0   ;;  %s3351_s22 = smov 0  }
  0x1a   :  { %s3353_s23 = smov 0   ;;  %s3355_s24 = smov 0  }
  0x1b   :  { %s3357_s25 = smov 0   ;;  %s3359_s26 = smov 0  }
  0x1c   :  { %s3361_s27 = smov 0   ;;  %s3363_s28 = smov 0  }
  0x1d   :  { %s3365_s29 = smov 0   ;;  %s3367_s30 = smov 0  }
  0x1e LB: > { %4173 = sst [smem:[#allocation26_spill]] %s3207_s17  ;;  %s3412_s12 = sadd.s32 4294967295, %s3259_s30   ;;  %s3259_s30 = sphi %s3367_s30, %s38_s30   ;;  %s3255_s29 = sphi %s3365_s29, %s4250_s29   ;;  %s3251_s28 = sphi %s3363_s28, %s4249_s28   ;;  %s3247_s27 = sphi %s3361_s27, %s4248_s27   ;;  %s3243_s26 = sphi %s3359_s26, %s4247_s26   ;;  %s3239_s25 = sphi %s3357_s25, %s4257_s25   ;;  %s3235_s24 = sphi %s3355_s24, %s4256_s24   ;;  %s3231_s23 = sphi %s3353_s23, %s4245_s23   ;;  %s3227_s22 = sphi %s3351_s22, %s4255_s22   ;;  %s3223_s21 = sphi %s3349_s21, %s4254_s21   ;;  %s3219_s20 = sphi %s3347_s20, %s4253_s20   ;;  %s3215_s19 = sphi %s3345_s19, %s4252_s19   ;;  %s3211_s18 = sphi %s3343_s18, %s4251_s18   ;;  %s3207_s17 = sphi %s3341_s17, %s4244_s17  }
  0x1f   : > { %4174 = sst [smem:[#allocation27_spill]] %s3211_s18  ;;  %p2220_p0 = scmp.ge.s32.totalorder %s3259_s30, 1 }
  0x20   : > { %4175 = sst [smem:[#allocation28_spill]] %s3235_s24  ;;  %p4150_p1 = scmp.eq.s32.totalorder %s3412_s12, 0 }
  0x21   : > { %4176 = sst [smem:[#allocation29_spill]] %s3243_s26  ;;  %p344_p3 = scmp.lt.s32.totalorder %s3259_s30, 9 }
  0x22   : > { %4177 = sst [smem:[#allocation30_spill]] %s3247_s27  ;;  %s3261_s14 = smov [#allocation8]  }
  0x23   : > { %4178 = sst [smem:[#allocation31_spill]] %s3251_s28  ;;  %p3418_p4 = pnand %p2220_p0, %p344_p3 }
  0x24   : > { %4179 = sst [smem:[#allocation32_spill]] %s3255_s29  ;;  %s359_s15 = sshll.u32 %s3261_s14, 4  ;;  %s360_s15 = int_to_ptr.vmem [resolvable:$true] %s359_s15 }
  0x25   : > { %s4180_s13 = scalar_select %p3418_p4, 1, 0 }
  0x26   : > { %p2572_p5 = pneg %p3418_p4  ;;  %s2888_s11 = scalar_lea.vmem %s360_s15, 1024 }
  0x27   : > { %4181 = sst [smem:[#allocation33_spill]] %s4180_s13  ;;  %p2889_p8 = scmp.ne.s32.totalorder %s360_s15, %s2888_s11 }
  0x28   : > { %p3426_p6 = pnand %p2572_p5, %p4150_p1  ;;  %p2896_p11 = scmp.lt.s32.totalorder %s360_s15, %s360_s15 }
  0x29   : > { %p2897_p12 = scmp.lt.s32.totalorder %s2888_s11, %s2888_s11 }
  0x2a   : > { %p2879_p7 = pneg %p3426_p6 }
  0x2b   : > { %p2898_p13 = por %p2897_p12, %p2896_p11 }
  0x2c   : > { %p2891_p9 = pnand %p2889_p8, %p2879_p7 }
  0x2e   : > { %p2892_p10 = pneg %p2891_p9 }
  0x30   : > { %p2899_p0 = pnand %p2898_p13, %p2892_p10 }
  0x32   : > { %2902 = shalt.err (!%p2899_p0)
}
  0x33   : > { %s4141_s14 = smov 64   ;;  %s4142_s10 = smov 4  }
  0x34   : > { %s4183_s3 = sld [smem:[#allocation41_spill]]  ;;  %s47_s9 = sadd.s32 1, %s3251_s28 }
  0x35   : > { %s50_s27 = sadd.s32 1, %s3255_s29  ;;  %p48_p3 = scmp.ge.s32.totalorder %s47_s9, 4 }
  0x36   : > { %s59_s6 = sadd.s32 1, %s3239_s25  ;;  %p66_p5 = scmp.ne.s32.totalorder %s3239_s25, %s3235_s24 }
  0x37   : > { %p4151_p8 = scmp.eq.s32.totalorder %s3259_s30, 0  ;;  %s4259_s9 = smov (%p48_p3, %s47_s9), 0 }
  0x38   : > { %4184 = sst [smem:[#allocation34_spill]] %s4259_s9  ;;  %s4261_s27 = smov (!%p48_p3, %s50_s27), %s3255_s29 }
  0x39   : > { %s3454_s4 = ssub.s32 %s3251_s28, %s4259_s9  ;;  %p3458_p9 = por %p4151_p8, %p66_p5 }
  0x3a   : > { %2575 = dma.hbm_to_vmem [thread:$0]  (!%p3426_p6), %s4183_s3, 1024, %s360_s15, [#allocation7], %s4141_s14, %s4141_s14, %s4142_s10  }
  0x3b   : > { %p52_p10 = scmp.ge.s32.totalorder %s4261_s27, 2  ;;  %p72_p11 = scmp.ne.s32.totalorder %s3235_s24, %s3231_s23 }
  0x3c   : > { %p83_p12 = scmp.eq.s32.totalorder %s3454_s4, 0  ;;  %p4152_p13 = scmp.lt.s32.totalorder %s3259_s30, 8 }
  0x3d   : > { %s4263_s27 = smov (%p52_p10, %s4261_s27), 0  ;;  %p3470_p0 = por %p4150_p1, %p72_p11 }
  0x3e   : > { %4186 = sst [smem:[#allocation35_spill]] %s4263_s27  ;;  %s3477_s14 = ssub.s32 %s3255_s29, %s4263_s27 }
  0x3f   : > { %s4187_s15 = scalar_select %p3470_p0, 1, 0 }
  0x40   : > { %s56_s10 = sor.u32 %s3454_s4, %s3477_s14  ;;  %s394_s23 = sand.u32 1, %s3239_s25  }
  0x41   : > { %4188 = sst [smem:[#allocation36_spill]] %s4187_s15  ;;  %p57_p5 = scmp.eq.s32.totalorder %s56_s10, 0 }
  0x42   : > { %s2224_s3 = sshll.u32 %s394_s23, 8  ;;  %s2226_s9 = sshll.u32 %s3251_s28, 2 }
  0x43   : > { %s3485_s2 = scalar_select %p57_p5, %s3239_s25, %s59_s6  }
  0x44   : > { %s2351_s26 = sshll.u32 %s3255_s29, 8  ;;  %s396_s13 = scalar_lea.vmem [#allocation3], %s2224_s3 }
  0x45   : > { %4189 = sst [smem:[#allocation37_spill]] %s3485_s2  ;;  %s403_s24 = sadd.s32 %s2351_s26, %s2226_s9 }
  0x46   : > { %s406_s15 = sshll.u32 %s396_s13, 4  ;;  %s2228_s11 = sshll.u32 %s403_s24, 6  ;;  %s407_s15 = int_to_ptr.vmem [resolvable:$true] %s406_s15 }
  0x47   : > { %s4190_s0 = sld [smem:[#allocation38_spill]]  ;;  %p3495_p10 = pnand %p4152_p13, %p3458_p9 }
  0x48   : > { %s4192_s10 = sand.u32 1, %s3259_s30   ;;  %s2916_s3 = scalar_lea.vmem %s407_s15, 4096 }
  0x49   : > { %s3501_s6 = scalar_lea.sflag [#allocation4], %s4192_s10  ;;  %p2905_p11 = pneg %p3495_p10 }
  0x4a   : > { %p2917_p5 = scmp.ne.s32.totalorder %s407_s15, %s2916_s3  ;;  %s3264_s9 = smov [#allocation3]  }
  0x4b   : > { %s2921_s24 = sshll.u32 %s3264_s9, 4  ;;  %s2922_s24 = int_to_ptr.vmem [resolvable:$false] %s2921_s24 }
  0x4c   : > { %p2919_p2 = pnand %p2917_p5, %p2905_p11  ;;  %s2923_s7 = scalar_lea.vmem %s2922_s24, 8192 }
  0x4d   : > { %s405_s17 = scalar_lea.hbm %s4190_s0, %s2228_s11  ;;  %p2924_p1 = scmp.lt.s32.totalorder %s407_s15, %s2922_s24 }
  0x4e   : > { %p2920_p3 = pneg %p2919_p2  ;;  %p2925_p8 = scmp.lt.s32.totalorder %s2923_s7, %s2916_s3 }
  0x50   : > { %p2926_p9 = por %p2925_p8, %p2924_p1 }
  0x52   : > { %p2927_p13 = pnand %p2926_p9, %p2920_p3 }
  0x54   : > { %2930 = shalt.err (!%p2927_p13)
}
  0x55   : > { %s3265_s26 = smov 1024   ;;  %s3266_s27 = smov 256  }
  0x56   : > { %s3267_s13 = smov 16   ;;  %s3268_s8 = smov [#allocation9]  }
  0x57   : > { %2582 = dma.hbm_to_vmem [thread:$0]  (!%p3495_p10), %s405_s17, 4096, %s407_s15, %s3501_s6, %s3265_s26, %s3266_s27, %s3267_s13  }
  0x58   : > { %s375_s11 = sshll.u32 %s3268_s8, 4  ;;  %s376_s11 = int_to_ptr.vmem [resolvable:$true] %s375_s11 }
  0x59   : > { %s2942_s23 = scalar_lea.vmem %s376_s11, 2048  ;;  %p2950_p1 = scmp.lt.s32.totalorder %s376_s11, %s376_s11 }
  0x5a   : > { %p2943_p2 = scmp.ne.s32.totalorder %s376_s11, %s2942_s23  ;;  %p2951_p8 = scmp.lt.s32.totalorder %s2942_s23, %s2942_s23 }
  0x5c   : > { %p2945_p11 = pnand %p2943_p2, %p2879_p7  ;;  %p2952_p13 = por %p2951_p8, %p2950_p1 }
  0x5e   : > { %p2946_p5 = pneg %p2945_p11 }
  0x60   : > { %p2953_p3 = pnand %p2952_p13, %p2946_p5 }
  0x62   : > { %2956 = shalt.err (!%p2953_p3)
}
  0x63   : > { %s4154_s10 = smov 128   ;;  %s4155_s17 = smov 8  }
  0x64   : > { %s4193_s5 = sld [smem:[#allocation43_spill]]  ;;  %s85_s3 = sadd.s32 1, %s3227_s22 }
  0x65   : > { %s3523_s9 = scalar_select %p83_p12, %s3227_s22, %s85_s3  }
  0x66   : > { %p92_p7 = scmp.ne.s32.totalorder %s3227_s22, %s3223_s21  ;;  %p98_p10 = scmp.ne.s32.totalorder %s3223_s21, %s3219_s20 }
  0x67   : > { %s418_s24 = sand.u32 1, %s3227_s22   ;;  %p4194_p9 = scmp.eq.s32.totalorder %s3259_s30, 0 }
  0x68   : > { %p4195_p11 = scmp.eq.s32.totalorder %s3412_s12, 0  ;;  %s2229_s7 = sshll.u32 %s418_s24, 8 }
  0x69   : > { %p94_p2 = por %p92_p7, %p4194_p9  ;;  %s2352_s26 = sshll.u32 %s3251_s28, 12 }
  0x6a   : > { %2578 = dma.hbm_to_vmem [thread:$0]  (!%p3426_p6), %s4193_s5, 2048, %s376_s11, [#allocation10], %s4154_s10, %s4154_s10, %s4155_s17  }
  0x6b   : > { %p3534_p5 = por %p98_p10, %p4195_p11  ;;  %s4197_s1 = sld [smem:[#allocation39_spill]] }
  0x6c   : > { %s420_s11 = scalar_lea.vmem [#allocation6], %s2229_s7  ;;  %p4198_p6 = scmp.lt.s32.totalorder %s3259_s30, 8 }
  0x6d   : > { %s427_s4 = sshll.u32 %s420_s11, 4  ;;  %s4200_s20 = sand.u32 1, %s3259_s30   ;;  %s428_s4 = int_to_ptr.vmem [resolvable:$true] %s427_s4 }
  0x6e   : > { %p3544_p12 = pnand %p4198_p6, %p94_p2  ;;  %s417_s18 = scalar_lea.sflag [#allocation7], %s4200_s20 }
  0x6f   : > { %s2970_s15 = scalar_lea.vmem %s428_s4, 4096  ;;  %s3271_s3 = smov [#allocation6]  }
  0x70   : > { %p2959_p1 = pneg %p3544_p12  ;;  %p2971_p8 = scmp.ne.s32.totalorder %s428_s4, %s2970_s15 }
  0x71   : > { %s426_s8 = scalar_lea.hbm %s4197_s1, %s2352_s26  ;;  %s2975_s24 = sshll.u32 %s3271_s3, 4  ;;  %s2976_s24 = int_to_ptr.vmem [resolvable:$false] %s2975_s24 }
  0x72   : > { %p2973_p13 = pnand %p2971_p8, %p2959_p1  ;;  %s2977_s7 = scalar_lea.vmem %s2976_s24, 8192 }
  0x73   : > { %p2978_p7 = scmp.lt.s32.totalorder %s428_s4, %s2976_s24  ;;  %p2979_p10 = scmp.lt.s32.totalorder %s2977_s7, %s2970_s15 }
  0x74   : > { %p2974_p3 = pneg %p2973_p13 }
  0x75   : > { %p2980_p9 = por %p2979_p10, %p2978_p7 }
  0x77   : > { %p2981_p2 = pnand %p2980_p9, %p2974_p3 }
  0x79   : > { %2984 = shalt.err (!%p2981_p2)
}
  0x7a   : > { %s4201_s26 = smov 4   ;;  %s4202_s27 = smov 64  }
  0x7b   : > { %s4203_s13 = sld [smem:[#allocation27_spill]]  ;;  %s4153_s20 = sadd.s32 4294967294, %s3259_s30  }
  0x7c   : > { %s4204_s11 = sld [smem:[#allocation26_spill]]  ;;  %s216_s23 = sadd.s32 1, %s3215_s19 }
  0x7d   : > { %2585 = dma.hbm_to_vmem [thread:$0]  (!%p3544_p12), %s426_s8, 4096, %s428_s4, %s417_s18, %s4202_s27, %s4202_s27, %s4201_s26  }
  0x7e   : > { %p4205_p11 = scmp.eq.s32.totalorder %s3477_s14, 0  ;;  %p259_p8 = scmp.eq.s32.totalorder %s4153_s20, 7 }
  0x7f   : > { %s439_s3 = sand.u32 1, %s3215_s19   ;;  %p4206_p13 = scmp.eq.s32.totalorder %s3259_s30, 0 }
  0x80   : > { %s3562_s15 = scalar_select %p4205_p11, %s3215_s19, %s216_s23  }
  0x81   : > { %p223_p6 = scmp.ne.s32.totalorder %s3215_s19, %s4203_s13  ;;  %p4207_p7 = scmp.eq.s32.totalorder %s3412_s12, 0 }
  0x82   : > { %p229_p1 = scmp.ne.s32.totalorder %s4203_s13, %s4204_s11  ;;  %p4209_p9 = scmp.eq.s32.totalorder %s3412_s12, 7 }
  0x83   : > { %p225_p3 = por %p223_p6, %p4206_p13  ;;  %s2232_s4 = sshll.u32 %s439_s3, 7 }
  0x84   : > { %p3575_p10 = por %p229_p1, %p4207_p7  ;;  %p3581_p12 = por %p4209_p9, %p223_p6 }
  0x85   : > { %p3585_p2 = por %p259_p8, %p229_p1  ;;  %s2353_s18 = sshll.u32 %s3255_s29, 11 }
  0x86   : > { %s4208_s24 = scalar_select %p3575_p10, 1, 0 }
  0x87   : > { %s4210_s8 = scalar_select %p3581_p12, 1, 0 }
  0x88   : > { %s4211_s14 = scalar_select %p3585_p2, 1, 0 }
  0x89   : > { %s4212_s27 = sld [smem:[#allocation45_spill]]  ;;  %s441_s11 = scalar_lea.vmem [#allocation11], %s2232_s4 }
  0x8a   : > { %s448_s23 = sshll.u32 %s441_s11, 4  ;;  %p4213_p11 = scmp.lt.s32.totalorder %s3259_s30, 8  ;;  %s449_s23 = int_to_ptr.vmem [resolvable:$true] %s448_s23 }
  0x8b   : > { %s2998_s10 = scalar_lea.vmem %s449_s23, 2048  ;;  %s3272_s3 = smov [#allocation11]  }
  0x8c   : > { %p3595_p13 = pnand %p4213_p11, %p225_p3  ;;  %p2999_p1 = scmp.ne.s32.totalorder %s449_s23, %s2998_s10 }
  0x8d   : > { %s3003_s17 = sshll.u32 %s3272_s3, 4  ;;  %s3004_s17 = int_to_ptr.vmem [resolvable:$false] %s3003_s17 }
  0x8e   : > { %p2987_p6 = pneg %p3595_p13  ;;  %s3005_s7 = scalar_lea.vmem %s3004_s17, 4096 }
  0x8f   : > { %s447_s13 = scalar_lea.hbm %s4212_s27, %s2353_s18  ;;  %p3006_p9 = scmp.lt.s32.totalorder %s449_s23, %s3004_s17 }
  0x90   : > { %p3001_p8 = pnand %p2999_p1, %p2987_p6  ;;  %p3007_p2 = scmp.lt.s32.totalorder %s3005_s7, %s2998_s10 }
  0x92   : > { %p3002_p7 = pneg %p3001_p8  ;;  %p3008_p12 = por %p3007_p2, %p3006_p9 }
  0x94   : > { %p3009_p10 = pnand %p3008_p12, %p3002_p7 }
  0x96   : > { %3012 = shalt.err (!%p3009_p10)
}
  0x97   : > { %s4215_s4 = smov 8   ;;  %s4216_s18 = smov 128  }
  0x98   : > { %2588 = dma.hbm_to_vmem [thread:$0]  (!%p3595_p13), %s447_s13, 2048, %s449_s23, %s3501_s6, %s4216_s18, %s4216_s18, %s4215_s4  }
  0x99   : > { %460 = sbr.rel (%p3418_p4) target bundleno = 1114 (0x45a), region = 52  ;;  %s4218_s27 = sld [smem:[#allocation28_spill]] (!%p3418_p4) }
  0x9a   : > { %s3610_s3 = sand.u32 (!%p3418_p4), 1, %s3412_s12  }
  0x9b   : > { %s463_s7 = scalar_lea.sflag (!%p3418_p4), [#allocation4], %s3610_s3 }
  0x9f   : > { %s464_s10 = sand.u32 1, %s4218_s27  }
  0xa0   : > { %s2236_s17 = sshll.u32 %s464_s10, 8 }
  0xa1   : > { %s3614_s0 = scalar_lea.vmem [#allocation3], %s2236_s17 }
  0xa2   : > { %3174 = dma.done.wait (%p3470_p0), %s463_s7, 4096  }
  0xa3   : > { %3176 = vsyncadd (%p3470_p0), %s463_s7, 4294963200  ;;  %s473_s6 = sand.u32 1, %s3223_s21   ;;  %s472_s13 = scalar_lea.sflag [#allocation7], %s3610_s3 }
  0xa4   : > { %s2237_s20 = sshll.u32 %s473_s6, 8 }
  0xa5   : > { %s3622_s23 = scalar_lea.vmem [#allocation6], %s2237_s20 }
  0xa6   : > { %3178 = dma.done.wait (%p3534_p5), %s472_s13, 4096  }
  0xa7   : > { %3180 = vsyncadd (%p3534_p5), %s472_s13, 4294963200  ;;  %p4220_p4 = scmp.eq.s32.totalorder %s3412_s12, 0 }
  0xa9   : > { %3182 = dma.done.wait (%p4220_p4), [#allocation7], 1024   ;;  %p4221_p3 = pmov %p4220_p4 }
  0xab   : > { %3184 = vsyncadd (%p4221_p3), [#allocation7], 4294966272  ;;  %p4222_p0 = pmov %p4221_p3 }
  0xad   : > { %3186 = dma.done.wait (%p4222_p0), [#allocation10], 2048   ;;  %p4223_p10 = pmov %p4222_p0 }
  0xae   : > { %s4224_s4 = sld [smem:[#allocation27_spill]]  ;;  %p4225_p5 = scmp.ne.s32.totalorder %s4208_s24, 0 }
  0xaf   : > { %3188 = vsyncadd (%p4223_p10), [#allocation10], 4294965248 }
  0xb4   : > { %s3637_s18 = sand.u32 1, %s4224_s4  }
  0xb5   : > { %s2240_s26 = sshll.u32 %s3637_s18, 7 }
  0xb6   : > { %s3640_s16 = scalar_lea.vmem [#allocation11], %s2240_s26 }
  0xb7   : > { %3190 = dma.done.wait (%p4225_p5), %s463_s7, 2048  }
  0xb8   : > { %3192 = vsyncadd (%p4225_p5), %s463_s7, 4294965248  ;;  %s3646_s27 = scalar_lea.vmem [#allocation12], %s2240_s26  ;;  %s3648_s11 = scalar_lea.vmem [#allocation13], %s2240_s26 }
  0xb9   : > { %s3650_s10 = scalar_lea.vmem [#allocation15], %s2240_s26  ;;  %s3652_s12 = scalar_lea.vmem [#allocation16], %s2240_s26 }
  0xba   : > { %s4226_s17 = sld [smem:[#allocation29_spill]] }
  0xc0   : > { %p2245_p12 = scmp.ne.s32.totalorder %s4226_s17, 0 }
  0xc2   : > { %568 = sbr.rel (%p2245_p12) target bundleno = 208 (0xd0), region = 76 }
  0xc7   : > { %v3273_v0 = vmov 0.0  }
  0xc8   : > { %569 = vst [vmem:[#allocation2 + $0x30] sm:$0xff] %v3273_v0  ;;  %570 = vst [vmem:[#allocation2] sm:$0xff] %v3273_v0 }
  0xc9   : > { %571 = vst [vmem:[#allocation2 + $0x58] sm:$0xff] %v3273_v0  ;;  %572 = vst [vmem:[#allocation2 + $0x18] sm:$0xff] %v3273_v0 }
  0xca   : > { %573 = vst [vmem:[#allocation2 + $0x50] sm:$0xff] %v3273_v0  ;;  %574 = vst [vmem:[#allocation2 + $0x68] sm:$0xff] %v3273_v0 }
  0xcb   : > { %575 = vst [vmem:[#allocation2 + $0x8] sm:$0xff] %v3273_v0  ;;  %576 = vst [vmem:[#allocation2 + $0x48] sm:$0xff] %v3273_v0 }
  0xcc   : > { %577 = vst [vmem:[#allocation2 + $0x40] sm:$0xff] %v3273_v0  ;;  %578 = vst [vmem:[#allocation2 + $0x20] sm:$0xff] %v3273_v0 }
  0xcd   : > { %579 = vst [vmem:[#allocation2 + $0x10] sm:$0xff] %v3273_v0  ;;  %580 = vst [vmem:[#allocation2 + $0x38] sm:$0xff] %v3273_v0 }
  0xce   : > { %581 = vst [vmem:[#allocation2 + $0x60] sm:$0xff] %v3273_v0  ;;  %582 = vst [vmem:[#allocation2 + $0x70] sm:$0xff] %v3273_v0 }
  0xcf   : > { %583 = vst [vmem:[#allocation2 + $0x78] sm:$0xff] %v3273_v0  ;;  %584 = vst [vmem:[#allocation2 + $0x28] sm:$0xff] %v3273_v0 }
  0xd0 PF: > { %v2733_v1 = vld [vmem:[%s3622_s23 + $0x78] sm:$0xff]   ;;  %v2737_v5 = vld [vmem:[%s3622_s23 + $0x70] sm:$0xff]   ;;  %v2741_v9 = vld [vmem:[%s3622_s23 + $0x68] sm:$0xff]  }
  0xd1   : > { %v2734_v2 = vld [vmem:[%s3622_s23 + $0xf8] sm:$0xff]   ;;  %2358 = vmatprep.subr.bf16.mxu0 %v2733_v1  ;;  %v2738_v6 = vld [vmem:[%s3622_s23 + $0xf0] sm:$0xff]   ;;  %v2742_v10 = vld [vmem:[%s3622_s23 + $0xe8] sm:$0xff]  }
  0xd2   : > { %v2735_v3 = vld [vmem:[%s3622_s23 + $0x38] sm:$0xff]   ;;  %2422 = vmatprep.subr.bf16.mxu1 %v2734_v2  ;;  %v2739_v7 = vld [vmem:[%s3622_s23 + $0x30] sm:$0xff]   ;;  %v2743_v11 = vld [vmem:[%s3622_s23 + $0x28] sm:$0xff]  }
  0xd3   : > { %v2736_v4 = vld [vmem:[%s3622_s23 + $0xb8] sm:$0xff]   ;;  %2359 = vmatpush3.bf16.msra.mxu0 %v2735_v3  ;;  %v2740_v8 = vld [vmem:[%s3622_s23 + $0xb0] sm:$0xff]   ;;  %v2744_v12 = vld [vmem:[%s3622_s23 + $0xa8] sm:$0xff]  }
  0xd4   : > { %2423 = vmatpush3.bf16.msra.mxu1 %v2736_v4  ;;  %2360 = vmatprep.subr.bf16.mxu0 %v2737_v5  ;;  %v2745_v13 = vld [vmem:[%s3622_s23 + $0x60] sm:$0xff]   ;;  %v2749_v17 = vld [vmem:[%s3622_s23 + $0x58] sm:$0xff]   ;;  %v2753_v21 = vld [vmem:[%s3622_s23 + $0x50] sm:$0xff]  }
  0xd5   : > { %2424 = vmatprep.subr.bf16.mxu1 %v2738_v6  ;;  %v2746_v14 = vld [vmem:[%s3622_s23 + $0xe0] sm:$0xff]   ;;  %v2750_v18 = vld [vmem:[%s3622_s23 + $0xd8] sm:$0xff]   ;;  %v2754_v22 = vld [vmem:[%s3622_s23 + $0xd0] sm:$0xff]  }
  0xd6   : > { %v2747_v15 = vld [vmem:[%s3622_s23 + $0x20] sm:$0xff]   ;;  %v2751_v19 = vld [vmem:[%s3622_s23 + $0x18] sm:$0xff]   ;;  %v2755_v23 = vld [vmem:[%s3622_s23 + $0x10] sm:$0xff]  }
  0xd7   : > { %2361 = vmatpush3.bf16.msra.mxu0 %v2739_v7  ;;  %v2748_v16 = vld [vmem:[%s3622_s23 + $0xa0] sm:$0xff]   ;;  %v2752_v20 = vld [vmem:[%s3622_s23 + $0x98] sm:$0xff]   ;;  %v2756_v24 = vld [vmem:[%s3622_s23 + $0x90] sm:$0xff]  }
  0xd8   : > { %2425 = vmatpush3.bf16.msra.mxu1 %v2740_v8  ;;  %2362 = vmatprep.subr.bf16.mxu0 %v2741_v9  ;;  %v2757_v25 = vld [vmem:[%s3622_s23 + $0x48] sm:$0xff]   ;;  %v2761_v29 = vld [vmem:[%s3622_s23 + $0x40] sm:$0xff]   ;;  %v585_v8 = vld [vmem:[#allocation2 + $0x30] sm:$0xff] }
  0xd9   : > { %2426 = vmatprep.subr.bf16.mxu1 %v2742_v10  ;;  %v2758_v26 = vld [vmem:[%s3622_s23 + $0xc8] sm:$0xff]   ;;  %v2762_v30 = vld [vmem:[%s3622_s23 + $0xc0] sm:$0xff]  }
  0xda   : > { %v2759_v27 = vld [vmem:[%s3622_s23 + $0x8] sm:$0xff]   ;;  %v2763_v31 = vld [vmem:[%s3622_s23] sm:$0xff]  }
  0xdb   : > { %2363 = vmatpush3.bf16.msra.mxu0 %v2743_v11  ;;  %v2760_v28 = vld [vmem:[%s3622_s23 + $0x88] sm:$0xff]   ;;  %v2764_v32 = vld [vmem:[%s3622_s23 + $0x80] sm:$0xff]  }
  0xdc   : > { %2427 = vmatpush3.bf16.msra.mxu1 %v2744_v12  ;;  %2364 = vmatprep.subr.bf16.mxu0 %v2745_v13  ;;  %v2765_v33 = vld [vmem:[%s3614_s0] ss:$16 sps:$4 sm:$0xff]   ;;  %v2767_v34 = vld [vmem:[%s3614_s0 + $0x4] ss:$16 sps:$4 sm:$0xff]   ;;  %v2768_v35 = vld [vmem:[%s3614_s0 + $0x8] ss:$16 sps:$4 sm:$0xff]  }
  0xdd   : > { %2428 = vmatprep.subr.bf16.mxu1 %v2746_v14  ;;  %v2770_v36 = vld [vmem:[%s3614_s0 + $0xc] ss:$16 sps:$4 sm:$0xff]   ;;  %1081 = vmatprep.mubr.bf16.mxu0 %v2767_v34  ;;  %v2771_v37 = vld [vmem:[%s3614_s0 + $0x24] ss:$16 sps:$4 sm:$0xff]   ;;  %v2775_v39 = vld [vmem:[%s3614_s0 + $0x20] ss:$16 sps:$4 sm:$0xff]  }
  0xde   : > { %1178 = vmatprep.mubr.bf16.mxu1 %v2770_v36  ;;  %v2773_v38 = vld [vmem:[%s3614_s0 + $0x2c] ss:$16 sps:$4 sm:$0xff]   ;;  %v2776_v40 = vld [vmem:[%s3614_s0 + $0x28] ss:$16 sps:$4 sm:$0xff]   ;;  %v2777_v41 = vld [vmem:[%s3614_s0 + $0x44] ss:$16 sps:$4 sm:$0xff]  }
  0xdf   : > { %2365 = vmatpush3.bf16.msra.mxu0 %v2747_v15  ;;  %v2779_v42 = vld [vmem:[%s3614_s0 + $0x4c] ss:$16 sps:$4 sm:$0xff]   ;;  %v2781_v43 = vld [vmem:[%s3614_s0 + $0x40] ss:$16 sps:$4 sm:$0xff]   ;;  %v2782_v44 = vld [vmem:[%s3614_s0 + $0x48] ss:$16 sps:$4 sm:$0xff]  }
  0xe0   : > { %2429 = vmatpush3.bf16.msra.mxu1 %v2748_v16  ;;  %2366 = vmatprep.subr.bf16.mxu0 %v2749_v17  ;;  %v2783_v45 = vld [vmem:[%s3614_s0 + $0x64] ss:$16 sps:$4 sm:$0xff]   ;;  %v2785_v46 = vld [vmem:[%s3614_s0 + $0x6c] ss:$16 sps:$4 sm:$0xff]   ;;  %v2787_v47 = vld [vmem:[%s3614_s0 + $0x60] ss:$16 sps:$4 sm:$0xff]  }
  0xe1   : > { %2430 = vmatprep.subr.bf16.mxu1 %v2750_v18  ;;  %v2788_v48 = vld [vmem:[%s3614_s0 + $0x68] ss:$16 sps:$4 sm:$0xff]   ;;  %v2789_v49 = vld [vmem:[%s3614_s0 + $0x84] ss:$16 sps:$4 sm:$0xff]   ;;  %v2791_v50 = vld [vmem:[%s3614_s0 + $0x8c] ss:$16 sps:$4 sm:$0xff]  }
  0xe2   : > { %v2793_v51 = vld [vmem:[%s3614_s0 + $0x80] ss:$16 sps:$4 sm:$0xff]   ;;  %v2794_v52 = vld [vmem:[%s3614_s0 + $0x88] ss:$16 sps:$4 sm:$0xff]   ;;  %v2795_v53 = vld [vmem:[%s3614_s0 + $0xa4] ss:$16 sps:$4 sm:$0xff]  }
  0xe3   : > { %2367 = vmatpush3.bf16.msra.mxu0 %v2751_v19  ;;  %v2797_v54 = vld [vmem:[%s3614_s0 + $0xac] ss:$16 sps:$4 sm:$0xff]   ;;  %v2799_v55 = vld [vmem:[%s3614_s0 + $0xa0] ss:$16 sps:$4 sm:$0xff]   ;;  %v2800_v56 = vld [vmem:[%s3614_s0 + $0xa8] ss:$16 sps:$4 sm:$0xff]  }
  0xe4   : > { %2431 = vmatpush3.bf16.msra.mxu1 %v2752_v20  ;;  %2368 = vmatprep.subr.bf16.mxu0 %v2753_v21  ;;  %v2801_v57 = vld [vmem:[%s3614_s0 + $0xc4] ss:$16 sps:$4 sm:$0xff]   ;;  %v2803_v58 = vld [vmem:[%s3614_s0 + $0xcc] ss:$16 sps:$4 sm:$0xff]   ;;  %v2805_v59 = vld [vmem:[%s3614_s0 + $0xc0] ss:$16 sps:$4 sm:$0xff]  }
  0xe5   : > { %2432 = vmatprep.subr.bf16.mxu1 %v2754_v22  ;;  %v2806_v60 = vld [vmem:[%s3614_s0 + $0xc8] ss:$16 sps:$4 sm:$0xff]   ;;  %v2807_v61 = vld [vmem:[%s3614_s0 + $0xe4] ss:$16 sps:$4 sm:$0xff]   ;;  %v2809_v62 = vld [vmem:[%s3614_s0 + $0xec] ss:$16 sps:$4 sm:$0xff]  }
  0xe6   : > { %v2811_v63 = vld [vmem:[%s3614_s0 + $0xe0] ss:$16 sps:$4 sm:$0xff]   ;;  %v2812_v0 = vld [vmem:[%s3614_s0 + $0xe8] ss:$16 sps:$4 sm:$0xff]   ;;  %s4227_s0 = sld [smem:[#allocation29_spill]] }
  0xe7   : > { %2369 = vmatpush3.bf16.msra.mxu0 %v2755_v23  ;;  %v586_v17 = vld [vmem:[#allocation2] sm:$0xff] }
  0xe8   : > { %2433 = vmatpush3.bf16.msra.mxu1 %v2756_v24  ;;  %2370 = vmatprep.subr.bf16.mxu0 %v2757_v25 }
  0xe9   : > { %2434 = vmatprep.subr.bf16.mxu1 %v2758_v26  ;;  %v587_v26 = vld [vmem:[#allocation2 + $0x58] sm:$0xff] }
  0xeb   : > { %2371 = vmatpush3.bf16.msra.mxu0 %v2759_v27 }
  0xec   : > { %2435 = vmatpush3.bf16.msra.mxu1 %v2760_v28  ;;  %2372 = vmatprep.subr.bf16.mxu0 %v2761_v29  ;;  %p2310_p2 = scmp.ne.s32.totalorder %s4227_s0, 3 }
  0xed   : > { %2436 = vmatprep.subr.bf16.mxu1 %v2762_v30  ;;  %s4228_s6 = sld [smem:[#allocation40_spill]] (!%p2310_p2) }
  0xee   : > { %s4229_s23 = sld [smem:[#allocation42_spill]] (!%p2310_p2) }
  0xef   : > { %2373 = vmatpush3.bf16.msra.mxu0 %v2763_v31  ;;  %s4230_s17 = sld [smem:[#allocation44_spill]] (!%p2310_p2) }
  0xf0   : > { %2437 = vmatpush3.bf16.msra.mxu1 %v2764_v32 }
  0xf2   : > { %1082 = vmatmul.mubr.bf16.vlgmr.msra.gmra.mxu0 %v2765_v33 }
  0xf3   : > { %1179 = vmatmul.mubr.bf16.vlgmr.msra.gmra.mxu1 %v2768_v35  ;;  %1089 = vmatprep.mubr.bf16.mxu0 %v2771_v37  ;;  %v588_v35 = vld [vmem:[#allocation2 + $0x18] sm:$0xff] }
  0xf4   : > { %1186 = vmatprep.mubr.bf16.mxu1 %v2773_v38 }
  0xfa   : > { %1090 = vmatmul.mubr.bf16.gmra.mxu0 %v2775_v39 }
  0xfb   : > { %1187 = vmatmul.mubr.bf16.gmra.mxu1 %v2776_v40  ;;  %1097 = vmatprep.mubr.bf16.mxu0 %v2777_v41 }
  0xfc   : > { %1194 = vmatprep.mubr.bf16.mxu1 %v2779_v42 }
 0x102   : > { %1098 = vmatmul.mubr.bf16.gmra.mxu0 %v2781_v43 }
 0x103   : > { %1195 = vmatmul.mubr.bf16.gmra.mxu1 %v2782_v44  ;;  %1105 = vmatprep.mubr.bf16.mxu0 %v2783_v45  ;;  %v589_v44 = vld [vmem:[#allocation2 + $0x50] sm:$0xff] }
 0x104   : > { %1202 = vmatprep.mubr.bf16.mxu1 %v2785_v46 }
 0x10a   : > { %1106 = vmatmul.mubr.bf16.gmra.mxu0 %v2787_v47 }
 0x10b   : > { %1203 = vmatmul.mubr.bf16.gmra.mxu1 %v2788_v48  ;;  %1113 = vmatprep.mubr.bf16.mxu0 %v2789_v49 }
 0x10c   : > { %1210 = vmatprep.mubr.bf16.mxu1 %v2791_v50 }
 0x112   : > { %1114 = vmatmul.mubr.bf16.gmra.mxu0 %v2793_v51 }
 0x113   : > { %1211 = vmatmul.mubr.bf16.gmra.mxu1 %v2794_v52  ;;  %1121 = vmatprep.mubr.bf16.mxu0 %v2795_v53  ;;  %v590_v53 = vld [vmem:[#allocation2 + $0x68] sm:$0xff] }
 0x114   : > { %1218 = vmatprep.mubr.bf16.mxu1 %v2797_v54 }
 0x11a   : > { %1122 = vmatmul.mubr.bf16.gmra.mxu0 %v2799_v55 }
 0x11b   : > { %1219 = vmatmul.mubr.bf16.gmra.mxu1 %v2800_v56  ;;  %1129 = vmatprep.mubr.bf16.mxu0 %v2801_v57 }
 0x11c   : > { %1226 = vmatprep.mubr.bf16.mxu1 %v2803_v58 }
 0x122   : > { %1130 = vmatmul.mubr.bf16.gmra.mxu0 %v2805_v59 }
 0x123   : > { %1227 = vmatmul.mubr.bf16.gmra.mxu1 %v2806_v60  ;;  %1137 = vmatprep.mubr.bf16.mxu0 %v2807_v61 }
 0x124   : > { %1234 = vmatprep.mubr.bf16.mxu1 %v2809_v62  ;;  %v591_v62 = vld [vmem:[#allocation2 + $0x8] sm:$0xff] }
 0x12a   : > { %1138 = vmatmul.mubr.bf16.gmra.mxu0 %v2811_v63 }
 0x12b   : > { %1235 = vmatmul.mubr.bf16.gmra.mxu1 %v2812_v0 }
 0x1b2   : > { %v2374_v1 = vpop.f32.mrf.mxu0 }
 0x1b3   : > { %v2438_v2 = vpop.f32.mrf.mxu1 }
 0x1b4   : > { %v2375_v3 = vpop.f32.mrf.mxu0 }
 0x1b5   : > { %v2376_v4 = vadd.f32 %v2375_v3, %v2374_v1  ;;  %v2439_v5 = vpop.f32.mrf.mxu1 }
 0x1b6   : > { %v2440_v6 = vadd.f32 %v2439_v5, %v2438_v2  ;;  %v2377_v7 = vpop.f32.mrf.mxu0 }
 0x1b7   : > { %v2441_v9 = vpop.f32.mrf.mxu1 }
 0x1b8   : > { %v1181_v10 = vadd.f32 %v2440_v6, %v2376_v4  ;;  %v2378_v11 = vpop.f32.mrf.mxu0 }
 0x1b9   : > { %v2379_v12 = vadd.f32 %v2378_v11, %v2377_v7  ;;  %v2442_v13 = vpop.f32.mrf.mxu1  ;;  %v592_v7 = vld [vmem:[#allocation2 + $0x48] sm:$0xff] }
 0x1ba   : > { %v1243_v14 = vadd.f32 %v1181_v10, %v585_v8  ;;  %v2443_v15 = vadd.f32 %v2442_v13, %v2441_v9  ;;  %v2380_v16 = vpop.f32.mrf.mxu0 }
 0x1bb   : > { %v2444_v18 = vpop.f32.mrf.mxu1 }
 0x1bc   : > { %1259 = vst [vmem:[#allocation2 + $0x30] sm:$0xff] %v1243_v14  ;;  %v1184_v19 = vadd.f32 %v2443_v15, %v2379_v12  ;;  %v2381_v20 = vpop.f32.mrf.mxu0 }
 0x1bd   : > { %v2382_v21 = vadd.f32 %v2381_v20, %v2380_v16  ;;  %v2445_v22 = vpop.f32.mrf.mxu1  ;;  %v593_v16 = vld [vmem:[#allocation2 + $0x40] sm:$0xff] }
 0x1be   : > { %v1244_v23 = vadd.f32 %v1184_v19, %v586_v17  ;;  %v2446_v24 = vadd.f32 %v2445_v22, %v2444_v18  ;;  %v2383_v25 = vpop.f32.mrf.mxu0 }
 0x1bf   : > { %v2447_v27 = vpop.f32.mrf.mxu1 }
 0x1c0   : > { %1260 = vst [vmem:[#allocation2] sm:$0xff] %v1244_v23  ;;  %v1189_v28 = vadd.f32 %v2446_v24, %v2382_v21  ;;  %v2384_v29 = vpop.f32.mrf.mxu0 }
 0x1c1   : > { %v2385_v30 = vadd.f32 %v2384_v29, %v2383_v25  ;;  %v2448_v31 = vpop.f32.mrf.mxu1  ;;  %v594_v25 = vld [vmem:[#allocation2 + $0x20] sm:$0xff] }
 0x1c2   : > { %v1245_v32 = vadd.f32 %v1189_v28, %v587_v26  ;;  %v2449_v33 = vadd.f32 %v2448_v31, %v2447_v27  ;;  %v2386_v34 = vpop.f32.mrf.mxu0 }
 0x1c3   : > { %v2450_v36 = vpop.f32.mrf.mxu1 }
 0x1c4   : > { %1261 = vst [vmem:[#allocation2 + $0x58] sm:$0xff] %v1245_v32  ;;  %v1192_v37 = vadd.f32 %v2449_v33, %v2385_v30  ;;  %v2387_v38 = vpop.f32.mrf.mxu0 }
 0x1c5   : > { %v2388_v39 = vadd.f32 %v2387_v38, %v2386_v34  ;;  %v2451_v40 = vpop.f32.mrf.mxu1  ;;  %v595_v34 = vld [vmem:[#allocation2 + $0x10] sm:$0xff] }
 0x1c6   : > { %v1246_v41 = vadd.f32 %v1192_v37, %v588_v35  ;;  %v2452_v42 = vadd.f32 %v2451_v40, %v2450_v36  ;;  %v2389_v43 = vpop.f32.mrf.mxu0 }
 0x1c7   : > { %v2453_v45 = vpop.f32.mrf.mxu1 }
 0x1c8   : > { %1262 = vst [vmem:[#allocation2 + $0x18] sm:$0xff] %v1246_v41  ;;  %v1197_v46 = vadd.f32 %v2452_v42, %v2388_v39  ;;  %v2390_v47 = vpop.f32.mrf.mxu0 }
 0x1c9   : > { %v2391_v48 = vadd.f32 %v2390_v47, %v2389_v43  ;;  %v2454_v49 = vpop.f32.mrf.mxu1  ;;  %v596_v43 = vld [vmem:[#allocation2 + $0x38] sm:$0xff] }
 0x1ca   : > { %v1247_v50 = vadd.f32 %v1197_v46, %v589_v44  ;;  %v2455_v51 = vadd.f32 %v2454_v49, %v2453_v45  ;;  %v2392_v52 = vpop.f32.mrf.mxu0 }
 0x1cb   : > { %v2456_v54 = vpop.f32.mrf.mxu1 }
 0x1cc   : > { %1263 = vst [vmem:[#allocation2 + $0x50] sm:$0xff] %v1247_v50  ;;  %v1200_v55 = vadd.f32 %v2455_v51, %v2391_v48  ;;  %v2393_v56 = vpop.f32.mrf.mxu0 }
 0x1cd   : > { %v2394_v57 = vadd.f32 %v2393_v56, %v2392_v52  ;;  %v2457_v58 = vpop.f32.mrf.mxu1  ;;  %v597_v52 = vld [vmem:[#allocation2 + $0x60] sm:$0xff] }
 0x1ce   : > { %v1248_v59 = vadd.f32 %v1200_v55, %v590_v53  ;;  %v2458_v60 = vadd.f32 %v2457_v58, %v2456_v54  ;;  %v2395_v61 = vpop.f32.mrf.mxu0 }
 0x1cf   : > { %v2459_v63 = vpop.f32.mrf.mxu1 }
 0x1d0   : > { %1264 = vst [vmem:[#allocation2 + $0x68] sm:$0xff] %v1248_v59  ;;  %v1205_v0 = vadd.f32 %v2458_v60, %v2394_v57  ;;  %v2396_v1 = vpop.f32.mrf.mxu0 }
 0x1d1   : > { %v2397_v2 = vadd.f32 %v2396_v1, %v2395_v61  ;;  %v2460_v3 = vpop.f32.mrf.mxu1  ;;  %v598_v61 = vld [vmem:[#allocation2 + $0x70] sm:$0xff] }
 0x1d2   : > { %v1249_v4 = vadd.f32 %v1205_v0, %v591_v62  ;;  %v2461_v5 = vadd.f32 %v2460_v3, %v2459_v63  ;;  %v2398_v6 = vpop.f32.mrf.mxu0 }
 0x1d3   : > { %v2462_v8 = vpop.f32.mrf.mxu1 }
 0x1d4   : > { %1265 = vst [vmem:[#allocation2 + $0x8] sm:$0xff] %v1249_v4  ;;  %v1208_v9 = vadd.f32 %v2461_v5, %v2397_v2  ;;  %v2399_v10 = vpop.f32.mrf.mxu0 }
 0x1d5   : > { %v2400_v11 = vadd.f32 %v2399_v10, %v2398_v6  ;;  %v2463_v12 = vpop.f32.mrf.mxu1  ;;  %v599_v6 = vld [vmem:[#allocation2 + $0x78] sm:$0xff] }
 0x1d6   : > { %v1250_v13 = vadd.f32 %v1208_v9, %v592_v7  ;;  %v2464_v14 = vadd.f32 %v2463_v12, %v2462_v8  ;;  %v2401_v15 = vpop.f32.mrf.mxu0 }
 0x1d7   : > { %v2465_v17 = vpop.f32.mrf.mxu1 }
 0x1d8   : > { %1266 = vst [vmem:[#allocation2 + $0x48] sm:$0xff] %v1250_v13  ;;  %v1213_v18 = vadd.f32 %v2464_v14, %v2400_v11  ;;  %v2402_v19 = vpop.f32.mrf.mxu0  ;;  %v600_v14 = vld [vmem:[#allocation2 + $0x28] sm:$0xff] }
 0x1d9   : > { %v2403_v20 = vadd.f32 %v2402_v19, %v2401_v15  ;;  %v2466_v21 = vpop.f32.mrf.mxu1 }
 0x1da   : > { %v1251_v22 = vadd.f32 %v1213_v18, %v593_v16  ;;  %v2467_v23 = vadd.f32 %v2466_v21, %v2465_v17  ;;  %v2404_v24 = vpop.f32.mrf.mxu0 }
 0x1db   : > { %v2468_v26 = vpop.f32.mrf.mxu1 }
 0x1dc   : > { %1267 = vst [vmem:[#allocation2 + $0x40] sm:$0xff] %v1251_v22  ;;  %v1216_v27 = vadd.f32 %v2467_v23, %v2403_v20  ;;  %v2405_v28 = vpop.f32.mrf.mxu0 }
 0x1dd   : > { %v2406_v29 = vadd.f32 %v2405_v28, %v2404_v24  ;;  %v2469_v30 = vpop.f32.mrf.mxu1 }
 0x1de   : > { %v1252_v31 = vadd.f32 %v1216_v27, %v594_v25  ;;  %v2470_v32 = vadd.f32 %v2469_v30, %v2468_v26  ;;  %v2407_v33 = vpop.f32.mrf.mxu0 }
 0x1df   : > { %v2471_v35 = vpop.f32.mrf.mxu1 }
 0x1e0   : > { %1268 = vst [vmem:[#allocation2 + $0x20] sm:$0xff] %v1252_v31  ;;  %v1221_v36 = vadd.f32 %v2470_v32, %v2406_v29  ;;  %v2408_v37 = vpop.f32.mrf.mxu0 }
 0x1e1   : > { %v2409_v38 = vadd.f32 %v2408_v37, %v2407_v33  ;;  %v2472_v39 = vpop.f32.mrf.mxu1 }
 0x1e2   : > { %v1253_v40 = vadd.f32 %v1221_v36, %v595_v34  ;;  %v2473_v41 = vadd.f32 %v2472_v39, %v2471_v35  ;;  %v2410_v42 = vpop.f32.mrf.mxu0 }
 0x1e3   : > { %v2474_v44 = vpop.f32.mrf.mxu1 }
 0x1e4   : > { %1269 = vst [vmem:[#allocation2 + $0x10] sm:$0xff] %v1253_v40  ;;  %v1224_v45 = vadd.f32 %v2473_v41, %v2409_v38  ;;  %v2411_v46 = vpop.f32.mrf.mxu0 }
 0x1e5   : > { %v2412_v47 = vadd.f32 %v2411_v46, %v2410_v42  ;;  %v2475_v48 = vpop.f32.mrf.mxu1 }
 0x1e6   : > { %v1254_v49 = vadd.f32 %v1224_v45, %v596_v43  ;;  %v2476_v50 = vadd.f32 %v2475_v48, %v2474_v44  ;;  %v2413_v51 = vpop.f32.mrf.mxu0 }
 0x1e7   : > { %v2477_v53 = vpop.f32.mrf.mxu1 }
 0x1e8   : > { %1270 = vst [vmem:[#allocation2 + $0x38] sm:$0xff] %v1254_v49  ;;  %v1229_v54 = vadd.f32 %v2476_v50, %v2412_v47  ;;  %v2414_v55 = vpop.f32.mrf.mxu0 }
 0x1e9   : > { %v2415_v56 = vadd.f32 %v2414_v55, %v2413_v51  ;;  %v2478_v57 = vpop.f32.mrf.mxu1 }
 0x1ea   : > { %v1255_v58 = vadd.f32 %v1229_v54, %v597_v52  ;;  %v2479_v59 = vadd.f32 %v2478_v57, %v2477_v53  ;;  %v2416_v60 = vpop.f32.mrf.mxu0 }
 0x1eb   : > { %v2480_v62 = vpop.f32.mrf.mxu1 }
 0x1ec   : > { %1271 = vst [vmem:[#allocation2 + $0x60] sm:$0xff] %v1255_v58  ;;  %v1232_v63 = vadd.f32 %v2479_v59, %v2415_v56  ;;  %v2417_v0 = vpop.f32.mrf.mxu0 }
 0x1ed   : > { %v2418_v1 = vadd.f32 %v2417_v0, %v2416_v60  ;;  %v2481_v2 = vpop.f32.mrf.mxu1 }
 0x1ee   : > { %v1256_v3 = vadd.f32 %v1232_v63, %v598_v61  ;;  %v2482_v4 = vadd.f32 %v2481_v2, %v2480_v62  ;;  %v2419_v5 = vpop.f32.mrf.mxu0 }
 0x1ef   : > { %v2483_v7 = vpop.f32.mrf.mxu1 }
 0x1f0   : > { %1272 = vst [vmem:[#allocation2 + $0x70] sm:$0xff] %v1256_v3  ;;  %v1237_v8 = vadd.f32 %v2482_v4, %v2418_v1  ;;  %v2420_v9 = vpop.f32.mrf.mxu0 }
 0x1f1   : > { %v2421_v10 = vadd.f32 %v2420_v9, %v2419_v5  ;;  %v2484_v11 = vpop.f32.mrf.mxu1 }
 0x1f2   : > { %v1257_v12 = vadd.f32 %v1237_v8, %v599_v6  ;;  %v2485_v13 = vadd.f32 %v2484_v11, %v2483_v7 }
 0x1f4   : > { %1273 = vst [vmem:[#allocation2 + $0x78] sm:$0xff] %v1257_v12  ;;  %v1240_v15 = vadd.f32 %v2485_v13, %v2421_v10  ;;  %1278 = sbr.rel (%p2310_p2) target bundleno = 1013 (0x3f5), region = 80 }
 0x1f6   : > { %v1258_v16 = vadd.f32 %v1240_v15, %v600_v14 }
 0x1f8   : > { %1274 = vst [vmem:[#allocation2 + $0x28] sm:$0xff] %v1258_v16 }
 0x1f9   : > { %v2813_v17 = vld [vmem:[#allocation8 + $0x38] sm:$0xff]   ;;  %v2814_v18 = vld [vmem:[#allocation8 + $0x30] sm:$0xff]   ;;  %v2815_v19 = vld [vmem:[#allocation8 + $0x28] sm:$0xff]  }
 0x1fa   : > { %2502 = vmatprep.subr.bf16.mxu0 %v2813_v17  ;;  %v2816_v20 = vld [vmem:[#allocation8 + $0x20] sm:$0xff]   ;;  %v1279_v21 = vld [vmem:[#allocation2 + $0x30] sm:$0xff]  ;;  %v2817_v28 = vld [vmem:[#allocation8 + $0x18] sm:$0xff]  }
 0x1fb   : > { %2503 = vmatpush3.bf16.msra.mxu0 %v2813_v17  ;;  %v1280_v22 = vld [vmem:[#allocation2] sm:$0xff]  ;;  %v2818_v30 = vld [vmem:[#allocation8 + $0x10] sm:$0xff]   ;;  %v1281_v34 = vld [vmem:[#allocation2 + $0x58] sm:$0xff] }
 0x1fc   : > { %2504 = vmatprep.subr.bf16.mxu0 %v2814_v18  ;;  %v3723_v23 = vld [vmem:[%s4228_s6] ss:$0 sm:$0xff]  ;;  %v2823_v31 = vld [vmem:[#allocation9 + $0x74] ss:$8 sps:$4 sm:$0xff]   ;;  %v2821_v32 = vld [vmem:[#allocation9 + $0x70] ss:$8 sps:$4 sm:$0xff]  }
 0x1fd   : > { %v1302_v24 = vadd.f32 %v3723_v23, %v1279_v21  ;;  %v1303_v25 = vadd.f32 %v3723_v23, %v1280_v22  ;;  %v2826_v33 = vld [vmem:[#allocation9 + $0x64] ss:$8 sps:$4 sm:$0xff]   ;;  %2534 = vmatprep.subr.bf16.mxu1 %v2823_v31  ;;  %v1282_v35 = vld [vmem:[#allocation2 + $0x18] sm:$0xff]  ;;  %v1283_v37 = vld [vmem:[#allocation2 + $0x50] sm:$0xff]  ;;  %v1304_v41 = vadd.f32 %v3723_v23, %v1281_v34  ;;  %v3274_v34 = vmov 0  }
 0x1fe   : > { %2542 = vmatpush1.bf16.msra.mxu1 %v2821_v32  ;;  %v2819_v36 = vld [vmem:[#allocation8 + $0x8] sm:$0xff]   ;;  %v2829_v40 = vld [vmem:[#allocation9 + $0x54] ss:$8 sps:$4 sm:$0xff]   ;;  %v1305_v42 = vadd.f32 %v3723_v23, %v1282_v35  ;;  %v1306_v43 = vadd.f32 %v3723_v23, %v1283_v37  ;;  %v2827_v45 = vld [vmem:[#allocation9 + $0x50] ss:$8 sps:$4 sm:$0xff]   ;;  %1694 = vmatprep.mubr.bf16.mxu1 %v3274_v34 }
 0x1ff   : > { %2505 = vmatpush3.bf16.msra.mxu0 %v2814_v18  ;;  %v1318_v26 = vmax.f32 %v1302_v24, 0.0  ;;  %v1319_v27 = vmax.f32 %v1303_v25, 0.0  ;;  %2535 = vmatprep.subr.bf16.mxu1 %v2826_v33  ;;  %v2824_v38 = vld [vmem:[#allocation9 + $0x60] ss:$8 sps:$4 sm:$0xff]   ;;  %v2832_v47 = vld [vmem:[#allocation9 + $0x44] ss:$8 sps:$4 sm:$0xff]  }
 0x200   : > { %2506 = vmatprep.subr.bf16.mxu0 %v2815_v19  ;;  %v1284_v39 = vld [vmem:[#allocation2 + $0x68] sm:$0xff]  ;;  %v2820_v46 = vld [vmem:[#allocation8] sm:$0xff]   ;;  %v1320_v48 = vmax.f32 %v1304_v41, 0.0  ;;  %v1321_v49 = vmax.f32 %v1305_v42, 0.0  ;;  %v1322_v50 = vmax.f32 %v1306_v43, 0.0  ;;  %v1289_v5 = vld [vmem:[#allocation2 + $0x10] sm:$0xff] }
 0x201   : > { %v1334_v29 = vpack.c.bf16 %v1319_v27, %v1318_v26  ;;  %v1307_v44 = vadd.f32 %v3723_v23, %v1284_v39  ;;  %v1285_v52 = vld [vmem:[#allocation2 + $0x8] sm:$0xff]  ;;  %v1287_v55 = vld [vmem:[#allocation2 + $0x40] sm:$0xff]  ;;  %v2835_v57 = vld [vmem:[#allocation9 + $0x34] ss:$8 sps:$4 sm:$0xff]   ;;  %v1312_v10 = vadd.f32 %v3723_v23, %v1289_v5 }
 0x202   : > { %2543 = vmatpush1.bf16.msra.mxu1 %v2824_v38  ;;  %v1286_v53 = vld [vmem:[#allocation2 + $0x48] sm:$0xff]  ;;  %v1288_v56 = vld [vmem:[#allocation2 + $0x20] sm:$0xff]  ;;  %v1335_v58 = vpack.c.bf16 %v1321_v49, %v1320_v48  ;;  %v1308_v59 = vadd.f32 %v3723_v23, %v1285_v52  ;;  %v1310_v62 = vadd.f32 %v3723_v23, %v1287_v55  ;;  %v2833_v0 = vld [vmem:[#allocation9 + $0x30] ss:$8 sps:$4 sm:$0xff]  }
 0x203   : > { %2507 = vmatpush3.bf16.msra.mxu0 %v2815_v19  ;;  %2518 = vmatprep.mubr.bf16.mxu0 %v1334_v29  ;;  %v1323_v51 = vmax.f32 %v1307_v44, 0.0  ;;  %v2830_v54 = vld [vmem:[#allocation9 + $0x40] ss:$8 sps:$4 sm:$0xff]   ;;  %v1309_v60 = vadd.f32 %v3723_v23, %v1286_v53  ;;  %v1311_v63 = vadd.f32 %v3723_v23, %v1288_v56  ;;  %v1290_v6 = vld [vmem:[#allocation2 + $0x38] sm:$0xff]  ;;  %v1292_v8 = vld [vmem:[#allocation2 + $0x70] sm:$0xff]  ;;  %v1328_v15 = vmax.f32 %v1312_v10, 0.0 }
 0x204   : > { %2508 = vmatprep.subr.bf16.mxu0 %v2816_v20  ;;  %2536 = vmatprep.subr.bf16.mxu1 %v2829_v40  ;;  %v1324_v1 = vmax.f32 %v1308_v59, 0.0  ;;  %v1326_v3 = vmax.f32 %v1310_v62, 0.0  ;;  %v1291_v7 = vld [vmem:[#allocation2 + $0x60] sm:$0xff]  ;;  %v1313_v11 = vadd.f32 %v3723_v23, %v1290_v6  ;;  %v1315_v14 = vadd.f32 %v3723_v23, %v1292_v8  ;;  %v1293_v19 = vld [vmem:[#allocation2 + $0x78] sm:$0xff] }
 0x205   : > { %v1336_v61 = vpack.c.bf16 %v1323_v51, %v1322_v50  ;;  %v1325_v2 = vmax.f32 %v1309_v60, 0.0  ;;  %v1327_v4 = vmax.f32 %v1311_v63, 0.0  ;;  %v1314_v13 = vadd.f32 %v3723_v23, %v1291_v7  ;;  %v2838_v29 = vld [vmem:[#allocation9 + $0x24] ss:$8 sps:$4 sm:$0xff]   ;;  %v3746_v35 = vld [vmem:[%s4229_s23] ss:$0 sm:$0xff] }
 0x206   : > { %2544 = vmatpush1.bf16.msra.mxu1 %v2827_v45  ;;  %v1329_v16 = vmax.f32 %v1313_v11, 0.0  ;;  %v1331_v18 = vmax.f32 %v1315_v14, 0.0  ;;  %v1316_v22 = vadd.f32 %v3723_v23, %v1293_v19 }
 0x207   : > { %2509 = vmatpush3.bf16.msra.mxu0 %v2816_v20  ;;  %2537 = vmatprep.subr.bf16.mxu1 %v2832_v47  ;;  %v1337_v9 = vpack.c.bf16 %v1325_v2, %v1324_v1  ;;  %v1338_v12 = vpack.c.bf16 %v1327_v4, %v1326_v3  ;;  %v1330_v17 = vmax.f32 %v1314_v13, 0.0  ;;  %v1294_v20 = vld [vmem:[#allocation2 + $0x28] sm:$0xff] }
 0x208   : > { %2510 = vmatprep.subr.bf16.mxu0 %v2817_v28  ;;  %v1339_v21 = vpack.c.bf16 %v1329_v16, %v1328_v15  ;;  %v1317_v24 = vadd.f32 %v3723_v23, %v1294_v20  ;;  %v1332_v26 = vmax.f32 %v1316_v22, 0.0  ;;  %v2844_v23 = vld [vmem:[#allocation9 + $0x4] ss:$8 sps:$4 sm:$0xff]  }
 0x209   : > { %v1340_v25 = vpack.c.bf16 %v1331_v18, %v1330_v17 }
 0x20a   : > { %2545 = vmatpush1.bf16.msra.mxu1 %v2830_v54  ;;  %v1333_v27 = vmax.f32 %v1317_v24, 0.0 }
 0x20b   : > { %2511 = vmatpush3.bf16.msra.mxu0 %v2817_v28  ;;  %2538 = vmatprep.subr.bf16.mxu1 %v2835_v57 }
 0x20c   : > { %2512 = vmatprep.subr.bf16.mxu0 %v2818_v30  ;;  %v1341_v28 = vpack.c.bf16 %v1333_v27, %v1332_v26 }
 0x20e   : > { %2546 = vmatpush1.bf16.msra.mxu1 %v2833_v0 }
 0x20f   : > { %2513 = vmatpush3.bf16.msra.mxu0 %v2818_v30  ;;  %v2836_v30 = vld [vmem:[#allocation9 + $0x20] ss:$8 sps:$4 sm:$0xff]   ;;  %2539 = vmatprep.subr.bf16.mxu1 %v2838_v29 }
 0x210   : > { %2514 = vmatprep.subr.bf16.mxu0 %v2819_v36 }
 0x212   : > { %2547 = vmatpush1.bf16.msra.mxu1 %v2836_v30 }
 0x213   : > { %2515 = vmatpush3.bf16.msra.mxu0 %v2819_v36 }
 0x214   : > { %2516 = vmatprep.subr.bf16.mxu0 %v2820_v46 }
 0x217   : > { %2517 = vmatpush3.bf16.msra.mxu0 %v2820_v46 }
 0x218   : > { %1642 = vmatprep.subr.bf16.mxu0 %v2823_v31  ;;  %v2841_v31 = vld [vmem:[#allocation9 + $0x14] ss:$8 sps:$4 sm:$0xff]  }
 0x219   : > { %2540 = vmatprep.subr.bf16.mxu1 %v2841_v31 }
 0x21a   : > { %2519 = vmatmul.mubr.bf16.vlgmr.msra.gmra.mxu0 %v1335_v58 }
 0x21b   : > { %2522 = vmatprep.mubr.bf16.mxu0 %v1336_v61  ;;  %1643 = vmatpush1.bf16.msra.mxu0 %v2821_v32  ;;  %v2839_v32 = vld [vmem:[#allocation9 + $0x10] ss:$8 sps:$4 sm:$0xff]  }
 0x21c   : > { %1644 = vmatprep.subr.bf16.mxu0 %v2826_v33  ;;  %2548 = vmatpush1.bf16.msra.mxu1 %v2839_v32  ;;  %v2842_v33 = vld [vmem:[#allocation9] ss:$8 sps:$4 sm:$0xff]  }
 0x21d   : > { %2541 = vmatprep.subr.bf16.mxu1 %v2844_v23 }
 0x21f   : > { %1645 = vmatpush1.bf16.msra.mxu0 %v2824_v38 }
 0x220   : > { %1646 = vmatprep.subr.bf16.mxu0 %v2829_v40  ;;  %2549 = vmatpush1.bf16.msra.mxu1 %v2842_v33 }
 0x222   : > { %2523 = vmatmul.mubr.bf16.gmra.mxu0 %v1337_v9 }
 0x223   : > { %2526 = vmatprep.mubr.bf16.mxu0 %v1338_v12  ;;  %1647 = vmatpush1.bf16.msra.mxu0 %v2827_v45 }
 0x224   : > { %1648 = vmatprep.subr.bf16.mxu0 %v2832_v47 }
 0x227   : > { %1649 = vmatpush1.bf16.msra.mxu0 %v2830_v54 }
 0x228   : > { %1650 = vmatprep.subr.bf16.mxu0 %v2835_v57 }
 0x22a   : > { %2527 = vmatmul.mubr.bf16.gmra.mxu0 %v1339_v21 }
 0x22b   : > { %2530 = vmatprep.mubr.bf16.mxu0 %v1340_v25  ;;  %1651 = vmatpush1.bf16.msra.mxu0 %v2833_v0 }
 0x22c   : > { %1652 = vmatprep.subr.bf16.mxu0 %v2838_v29  ;;  %v1552_v29 = vlaneseq }
 0x22f   : > { %1653 = vmatpush1.bf16.msra.mxu0 %v2836_v30  ;;  %v1553_v30 = vshrl.u32 %v1552_v29, 7 }
 0x230   : > { %1654 = vmatprep.subr.bf16.mxu0 %v2841_v31 }
 0x231   : > { %v1554_v31 = vsub.s32 0, %v1553_v30 }
 0x232   : > { %2531 = vmatmul.mubr.bf16.gmra.mxu0 %v1341_v28 }
 0x233   : > { %1655 = vmatpush1.bf16.msra.mxu0 %v2839_v32  ;;  %1674 = vmatprep.mubr.bf16.mxu0 %v3274_v34  ;;  %v1550_v32 = vld [vmem:[%s4230_s17] sm:$0x3] }
 0x234   : > { %1656 = vmatprep.subr.bf16.mxu0 %v2844_v23  ;;  %v1558_v23 = vsub.s32 1, %v1553_v30 }
 0x237   : > { %1657 = vmatpush1.bf16.msra.mxu0 %v2842_v33  ;;  %v3789_v33 = vrot.slane %v1550_v32, %v1554_v31 }
 0x2da   : > { %v2520_v36 = vpop.f32.mrf.mxu0 }
 0x2db   : > { %v1456_v37 = vadd.f32 %v2520_v36, %v3746_v35 }
 0x2dc   : > { %v1447_v38 = vpop.f32.mrf.mxu0 }
 0x2dd   : > { %v1512_v39 = vmax.f32 %v1456_v37, 0.0  ;;  %v1448_v40 = vadd.f32 %v3746_v35, %v1447_v38 }
 0x2de   : > { %v2521_v41 = vpop.f32.mrf.mxu0 }
 0x2df   : > { %1837 = vst [vmem:[%s3646_s27 + $0x10] sm:$0xff] %v1512_v39  ;;  %v1510_v42 = vmax.f32 %v1448_v40, 0.0  ;;  %v1459_v43 = vadd.f32 %v2521_v41, %v3746_v35 }
 0x2e0   : > { %v1450_v44 = vpop.f32.mrf.mxu0 }
 0x2e1   : > { %1835 = vst [vmem:[%s3646_s27] sm:$0xff] %v1510_v42  ;;  %v1513_v45 = vmax.f32 %v1459_v43, 0.0  ;;  %v1451_v46 = vadd.f32 %v3746_v35, %v1450_v44 }
 0x2e2   : > { %v2524_v47 = vpop.f32.mrf.mxu0 }
 0x2e3   : > { %1838 = vst [vmem:[%s3646_s27 + $0x18] sm:$0xff] %v1513_v45  ;;  %v1511_v48 = vmax.f32 %v1451_v46, 0.0  ;;  %v1472_v49 = vadd.f32 %v2524_v47, %v3746_v35  ;;  %v1527_v0 = vpack.c.bf16 %v1513_v45, %v1512_v39 }
 0x2e4   : > { %v1463_v50 = vpop.f32.mrf.mxu0 }
 0x2e5   : > { %v1526_v51 = vpack.c.bf16 %v1511_v48, %v1510_v42  ;;  %1836 = vst [vmem:[%s3646_s27 + $0x8] sm:$0xff] %v1511_v48  ;;  %v1516_v52 = vmax.f32 %v1472_v49, 0.0  ;;  %v1464_v53 = vadd.f32 %v3746_v35, %v1463_v50 }
 0x2e6   : > { %v2525_v54 = vpop.f32.mrf.mxu0 }
 0x2e7   : > { %1841 = vst [vmem:[%s3646_s27 + $0x30] sm:$0xff] %v1516_v52  ;;  %v1514_v55 = vmax.f32 %v1464_v53, 0.0  ;;  %v1475_v56 = vadd.f32 %v2525_v54, %v3746_v35  ;;  %1675 = vmatmul.mubr.bf16.vlgmr.msra.gmra.mxu0 %v1526_v51 }
 0x2e8   : > { %v1466_v57 = vpop.f32.mrf.mxu0  ;;  %1684 = vmatprep.mubr.bf16.mxu0 %v3274_v34 }
 0x2e9   : > { %1839 = vst [vmem:[%s3646_s27 + $0x20] sm:$0xff] %v1514_v55  ;;  %v1517_v58 = vmax.f32 %v1475_v56, 0.0  ;;  %v1467_v59 = vadd.f32 %v3746_v35, %v1466_v57 }
 0x2ea   : > { %v2528_v60 = vpop.f32.mrf.mxu0 }
 0x2eb   : > { %1842 = vst [vmem:[%s3646_s27 + $0x38] sm:$0xff] %v1517_v58  ;;  %v1515_v61 = vmax.f32 %v1467_v59, 0.0  ;;  %v1488_v62 = vadd.f32 %v2528_v60, %v3746_v35  ;;  %v1529_v14 = vpack.c.bf16 %v1517_v58, %v1516_v52 }
 0x2ec   : > { %v1479_v63 = vpop.f32.mrf.mxu0 }
 0x2ed   : > { %v1528_v1 = vpack.c.bf16 %v1515_v61, %v1514_v55  ;;  %1840 = vst [vmem:[%s3646_s27 + $0x28] sm:$0xff] %v1515_v61  ;;  %v1520_v2 = vmax.f32 %v1488_v62, 0.0  ;;  %v1480_v3 = vadd.f32 %v3746_v35, %v1479_v63 }
 0x2ee   : > { %v2529_v4 = vpop.f32.mrf.mxu0 }
 0x2ef   : > { %1845 = vst [vmem:[%s3646_s27 + $0x50] sm:$0xff] %v1520_v2  ;;  %v1518_v5 = vmax.f32 %v1480_v3, 0.0  ;;  %1685 = vmatmul.mubr.bf16.gmra.mxu0 %v1527_v0  ;;  %1695 = vmatmul.mubr.bf16.vlgmr.msra.gmra.mxu1 %v1528_v1  ;;  %v1491_v6 = vadd.f32 %v2529_v4, %v3746_v35  ;;  %v1755_v3 = vld [vmem:[%s3640_s16] sm:$0xff] }
 0x2f0   : > { %v1482_v7 = vpop.f32.mrf.mxu0  ;;  %1704 = vmatprep.mubr.bf16.mxu1 %v3274_v34 }
 0x2f1   : > { %1843 = vst [vmem:[%s3646_s27 + $0x40] sm:$0xff] %v1518_v5  ;;  %v1521_v8 = vmax.f32 %v1491_v6, 0.0  ;;  %v1483_v9 = vadd.f32 %v3746_v35, %v1482_v7 }
 0x2f2   : > { %v2532_v10 = vpop.f32.mrf.mxu0 }
 0x2f3   : > { %1846 = vst [vmem:[%s3646_s27 + $0x58] sm:$0xff] %v1521_v8  ;;  %v1519_v11 = vmax.f32 %v1483_v9, 0.0  ;;  %v1504_v12 = vadd.f32 %v2532_v10, %v3746_v35  ;;  %v1531_v26 = vpack.c.bf16 %v1521_v8, %v1520_v2 }
 0x2f4   : > { %v1495_v13 = vpop.f32.mrf.mxu0 }
 0x2f5   : > { %1844 = vst [vmem:[%s3646_s27 + $0x48] sm:$0xff] %v1519_v11  ;;  %v1524_v15 = vmax.f32 %v1504_v12, 0.0  ;;  %v1496_v16 = vadd.f32 %v3746_v35, %v1495_v13  ;;  %v1530_v25 = vpack.c.bf16 %v1519_v11, %v1518_v5  ;;  %v1756_v11 = vld [vmem:[%s3640_s16 + $0x8] sm:$0xff] }
 0x2f6   : > { %v2533_v17 = vpop.f32.mrf.mxu0 }
 0x2f7   : > { %1705 = vmatmul.mubr.bf16.gmra.mxu1 %v1529_v14  ;;  %1849 = vst [vmem:[%s3646_s27 + $0x70] sm:$0xff] %v1524_v15  ;;  %v1522_v18 = vmax.f32 %v1496_v16, 0.0  ;;  %v1507_v19 = vadd.f32 %v2533_v17, %v3746_v35 }
 0x2f8   : > { %1714 = vmatprep.mubr.bf16.mxu1 %v3274_v34  ;;  %v1498_v20 = vpop.f32.mrf.mxu0 }
 0x2f9   : > { %1847 = vst [vmem:[%s3646_s27 + $0x60] sm:$0xff] %v1522_v18  ;;  %v1525_v21 = vmax.f32 %v1507_v19, 0.0  ;;  %v1499_v22 = vadd.f32 %v3746_v35, %v1498_v20  ;;  %v3791_v35 = vrot.slane %v1550_v32, %v1558_v23  ;;  %v1757_v20 = vld [vmem:[%s3640_s16 + $0x10] sm:$0xff]  ;;  %v1758_v23 = vld [vmem:[%s3640_s16 + $0x18] sm:$0xff] }
 0x2fb   : > { %1850 = vst [vmem:[%s3646_s27 + $0x78] sm:$0xff] %v1525_v21  ;;  %v1523_v24 = vmax.f32 %v1499_v22, 0.0  ;;  %v1533_v28 = vpack.c.bf16 %v1525_v21, %v1524_v15 }
 0x2fd   : > { %1848 = vst [vmem:[%s3646_s27 + $0x68] sm:$0xff] %v1523_v24  ;;  %v1532_v27 = vpack.c.bf16 %v1523_v24, %v1522_v18  ;;  %v1759_v24 = vld [vmem:[%s3640_s16 + $0x20] sm:$0xff] }
 0x2ff   : > { %1715 = vmatmul.mubr.bf16.gmra.mxu1 %v1530_v25 }
 0x300   : > { %1724 = vmatprep.mubr.bf16.mxu1 %v3274_v34 }
 0x307   : > { %1725 = vmatmul.mubr.bf16.gmra.mxu1 %v1531_v26 }
 0x308   : > { %1734 = vmatprep.mubr.bf16.mxu1 %v3274_v34 }
 0x30f   : > { %1735 = vmatmul.mubr.bf16.gmra.mxu1 %v1532_v27 }
 0x310   : > { %1744 = vmatprep.mubr.bf16.mxu1 %v3274_v34 }
 0x317   : > { %1745 = vmatmul.mubr.bf16.gmra.mxu1 %v1533_v28 }
 0x3a7   : > { %v1676_v36 = vpop.f32.mrf.mxu0 }
 0x3a8   : > { %v1677_v34 = vadd.f32 %v1676_v36, %v3789_v33 }
 0x3a9   : > { %v1678_v37 = vpop.f32.mrf.mxu0 }
 0x3aa   : > { %1851 = vst [vmem:[%s3648_s11] sm:$0xff] %v1677_v34  ;;  %v1679_v38 = vadd.f32 %v1678_v37, %v3791_v35  ;;  %v1760_v37 = vld [vmem:[%s3640_s16 + $0x28] sm:$0xff] }
 0x3ab   : > { %v1680_v39 = vpop.f32.mrf.mxu0 }
 0x3ac   : > { %v1771_v40 = vmul.f32 1.442695, %v1679_v38  ;;  %1867 = vst [vmem:[%s3650_s10] sm:$0xff] %v1679_v38  ;;  %v3798_v41 = vadd.f32 %v1680_v39, %v3789_v33 }
 0x3ad   : > { %v1682_v42 = vpop.f32.mrf.mxu0 }
 0x3ae   : > { %2845 = vpow2.f32 %v1771_v40  ;;  %1852 = vst [vmem:[%s3648_s11 + $0x8] sm:$0xff] %v3798_v41  ;;  %v1683_v43 = vadd.f32 %v1682_v42, %v3791_v35 }
 0x3af   : > { %v1686_v44 = vpop.f32.mrf.mxu0  ;;  %v1696_v45 = vpop.f32.mrf.mxu1 }
 0x3b0   : > { %v1773_v46 = vmul.f32 1.442695, %v1683_v43  ;;  %1868 = vst [vmem:[%s3650_s10 + $0x8] sm:$0xff] %v1683_v43  ;;  %v3805_v47 = vadd.f32 %v1686_v44, %v3789_v33  ;;  %v3808_v48 = vadd.f32 %v1696_v45, %v3789_v33 }
 0x3b1   : > { %v1688_v49 = vpop.f32.mrf.mxu0  ;;  %v1698_v50 = vpop.f32.mrf.mxu1 }
 0x3b2   : > { %2847 = vpow2.f32 %v1773_v46  ;;  %1853 = vst [vmem:[%s3648_s11 + $0x10] sm:$0xff] %v3805_v47  ;;  %1855 = vst [vmem:[%s3648_s11 + $0x20] sm:$0xff] %v3808_v48  ;;  %v1689_v51 = vadd.f32 %v1688_v49, %v3791_v35  ;;  %v1699_v52 = vadd.f32 %v1698_v50, %v3791_v35 }
 0x3b3   : > { %v1690_v53 = vpop.f32.mrf.mxu0  ;;  %v1700_v54 = vpop.f32.mrf.mxu1 }
 0x3b4   : > { %v1775_v55 = vmul.f32 1.442695, %v1689_v51  ;;  %1869 = vst [vmem:[%s3650_s10 + $0x10] sm:$0xff] %v1689_v51  ;;  %v1779_v56 = vmul.f32 1.442695, %v1699_v52  ;;  %1871 = vst [vmem:[%s3650_s10 + $0x20] sm:$0xff] %v1699_v52  ;;  %v3819_v57 = vadd.f32 %v1690_v53, %v3789_v33  ;;  %v3822_v58 = vadd.f32 %v1700_v54, %v3789_v33 }
 0x3b5   : > { %v1692_v59 = vpop.f32.mrf.mxu0  ;;  %v1702_v60 = vpop.f32.mrf.mxu1 }
 0x3b6   : > { %2849 = vpow2.f32 %v1775_v55  ;;  %1854 = vst [vmem:[%s3648_s11 + $0x18] sm:$0xff] %v3819_v57  ;;  %1856 = vst [vmem:[%s3648_s11 + $0x28] sm:$0xff] %v3822_v58  ;;  %v1693_v61 = vadd.f32 %v1692_v59, %v3791_v35  ;;  %v1703_v62 = vadd.f32 %v1702_v60, %v3791_v35 }
 0x3b7   : > { %2851 = vpow2.f32 %v1779_v56  ;;  %v1706_v63 = vpop.f32.mrf.mxu1 }
 0x3b8   : > { %v1777_v0 = vmul.f32 1.442695, %v1693_v61  ;;  %1870 = vst [vmem:[%s3650_s10 + $0x18] sm:$0xff] %v1693_v61  ;;  %v1781_v1 = vmul.f32 1.442695, %v1703_v62  ;;  %1872 = vst [vmem:[%s3650_s10 + $0x28] sm:$0xff] %v1703_v62  ;;  %v3833_v2 = vadd.f32 %v1706_v63, %v3789_v33 }
 0x3b9   : > { %v1708_v4 = vpop.f32.mrf.mxu1 }
 0x3ba   : > { %2853 = vpow2.f32 %v1777_v0  ;;  %1857 = vst [vmem:[%s3648_s11 + $0x30] sm:$0xff] %v3833_v2  ;;  %v1709_v5 = vadd.f32 %v1708_v4, %v3791_v35 }
 0x3bb   : > { %v2846_v6 = vpop.eup %2845  ;;  %2855 = vpow2.f32 %v1781_v1  ;;  %v1710_v7 = vpop.f32.mrf.mxu1 }
 0x3bc   : > { %v1803_v8 = vmul.f32 %v2846_v6, %v1755_v3  ;;  %v1783_v9 = vmul.f32 1.442695, %v1709_v5  ;;  %1873 = vst [vmem:[%s3650_s10 + $0x30] sm:$0xff] %v1709_v5  ;;  %v3841_v10 = vadd.f32 %v1710_v7, %v3789_v33  ;;  %v1763_v3 = vld [vmem:[%s3640_s16 + $0x40] sm:$0xff] }
 0x3bd   : > { %v1712_v12 = vpop.f32.mrf.mxu1 }
 0x3be   : > { %v1819_v13 = vadd.f32 %v1803_v8, %v1677_v34  ;;  %2857 = vpow2.f32 %v1783_v9  ;;  %1858 = vst [vmem:[%s3648_s11 + $0x38] sm:$0xff] %v3841_v10  ;;  %v1713_v14 = vadd.f32 %v1712_v12, %v3791_v35  ;;  %v1764_v12 = vld [vmem:[%s3640_s16 + $0x48] sm:$0xff] }
 0x3bf   : > { %v2848_v15 = vpop.eup %2847  ;;  %v1716_v16 = vpop.f32.mrf.mxu1 }
 0x3c0   : > { %1883 = vst [vmem:[%s3652_s12] sm:$0xff] %v1819_v13  ;;  %v1804_v17 = vmul.f32 %v2848_v15, %v1756_v11  ;;  %v1785_v18 = vmul.f32 1.442695, %v1713_v14  ;;  %1874 = vst [vmem:[%s3650_s10 + $0x38] sm:$0xff] %v1713_v14  ;;  %v3850_v19 = vadd.f32 %v1716_v16, %v3789_v33 }
 0x3c1   : > { %v1718_v21 = vpop.f32.mrf.mxu1 }
 0x3c2   : > { %v1820_v22 = vadd.f32 %v1804_v17, %v3798_v41  ;;  %2859 = vpow2.f32 %v1785_v18  ;;  %1859 = vst [vmem:[%s3648_s11 + $0x40] sm:$0xff] %v3850_v19  ;;  %v1719_v25 = vadd.f32 %v1718_v21, %v3791_v35  ;;  %v1765_v21 = vld [vmem:[%s3640_s16 + $0x50] sm:$0xff] }
 0x3c3   : > { %v2850_v26 = vpop.eup %2849  ;;  %v1720_v27 = vpop.f32.mrf.mxu1 }
 0x3c4   : > { %v2852_v28 = vpop.eup %2851  ;;  %1884 = vst [vmem:[%s3652_s12 + $0x8] sm:$0xff] %v1820_v22  ;;  %v1805_v29 = vmul.f32 %v2850_v26, %v1757_v20  ;;  %v1787_v30 = vmul.f32 1.442695, %v1719_v25  ;;  %1875 = vst [vmem:[%s3650_s10 + $0x40] sm:$0xff] %v1719_v25  ;;  %v3861_v31 = vadd.f32 %v1720_v27, %v3789_v33 }
 0x3c5   : > { %v1807_v32 = vmul.f32 %v2852_v28, %v1759_v24  ;;  %v1722_v36 = vpop.f32.mrf.mxu1 }
 0x3c6   : > { %v1821_v34 = vadd.f32 %v1805_v29, %v3805_v47  ;;  %2861 = vpow2.f32 %v1787_v30  ;;  %1860 = vst [vmem:[%s3648_s11 + $0x48] sm:$0xff] %v3861_v31  ;;  %v1723_v38 = vadd.f32 %v1722_v36, %v3791_v35  ;;  %v1761_v47 = vld [vmem:[%s3640_s16 + $0x30] sm:$0xff]  ;;  %v1766_v30 = vld [vmem:[%s3640_s16 + $0x58] sm:$0xff] }
 0x3c7   : > { %v2854_v39 = vpop.eup %2853  ;;  %v1823_v40 = vadd.f32 %v1807_v32, %v3808_v48  ;;  %v1726_v41 = vpop.f32.mrf.mxu1 }
 0x3c8   : > { %v2856_v42 = vpop.eup %2855  ;;  %1885 = vst [vmem:[%s3652_s12 + $0x10] sm:$0xff] %v1821_v34  ;;  %v1806_v43 = vmul.f32 %v2854_v39, %v1758_v23  ;;  %v1789_v44 = vmul.f32 1.442695, %v1723_v38  ;;  %1876 = vst [vmem:[%s3650_s10 + $0x48] sm:$0xff] %v1723_v38  ;;  %v3873_v45 = vadd.f32 %v1726_v41, %v3789_v33  ;;  %v1767_v38 = vld [vmem:[%s3640_s16 + $0x60] sm:$0xff]  ;;  %v1768_v41 = vld [vmem:[%s3640_s16 + $0x68] sm:$0xff] }
 0x3c9   : > { %1887 = vst [vmem:[%s3652_s12 + $0x20] sm:$0xff] %v1823_v40  ;;  %v1808_v46 = vmul.f32 %v2856_v42, %v1760_v37  ;;  %v1728_v49 = vpop.f32.mrf.mxu1 }
 0x3ca   : > { %v1822_v50 = vadd.f32 %v1806_v43, %v3819_v57  ;;  %2863 = vpow2.f32 %v1789_v44  ;;  %1861 = vst [vmem:[%s3648_s11 + $0x50] sm:$0xff] %v3873_v45  ;;  %v1729_v48 = vadd.f32 %v1728_v49, %v3791_v35  ;;  %v1762_v57 = vld [vmem:[%s3640_s16 + $0x38] sm:$0xff]  ;;  %v1769_v44 = vld [vmem:[%s3640_s16 + $0x70] sm:$0xff] }
 0x3cb   : > { %v2858_v51 = vpop.eup %2857  ;;  %v1824_v52 = vadd.f32 %v1808_v46, %v3822_v58  ;;  %v1730_v53 = vpop.f32.mrf.mxu1  ;;  %v1770_v49 = vld [vmem:[%s3640_s16 + $0x78] sm:$0xff] }
 0x3cc   : > { %1886 = vst [vmem:[%s3652_s12 + $0x18] sm:$0xff] %v1822_v50  ;;  %v1809_v54 = vmul.f32 %v2858_v51, %v1761_v47  ;;  %v1791_v55 = vmul.f32 1.442695, %v1729_v48  ;;  %1877 = vst [vmem:[%s3650_s10 + $0x50] sm:$0xff] %v1729_v48  ;;  %v3885_v56 = vadd.f32 %v1730_v53, %v3789_v33 }
 0x3cd   : > { %1888 = vst [vmem:[%s3652_s12 + $0x28] sm:$0xff] %v1824_v52  ;;  %v1732_v59 = vpop.f32.mrf.mxu1 }
 0x3ce   : > { %v1825_v60 = vadd.f32 %v1809_v54, %v3833_v2  ;;  %2865 = vpow2.f32 %v1791_v55  ;;  %1862 = vst [vmem:[%s3648_s11 + $0x58] sm:$0xff] %v3885_v56  ;;  %v1733_v58 = vadd.f32 %v1732_v59, %v3791_v35 }
 0x3cf   : > { %v2860_v61 = vpop.eup %2859  ;;  %v1736_v62 = vpop.f32.mrf.mxu1 }
 0x3d0   : > { %1889 = vst [vmem:[%s3652_s12 + $0x30] sm:$0xff] %v1825_v60  ;;  %v1810_v63 = vmul.f32 %v2860_v61, %v1762_v57  ;;  %v1793_v0 = vmul.f32 1.442695, %v1733_v58  ;;  %1878 = vst [vmem:[%s3650_s10 + $0x58] sm:$0xff] %v1733_v58  ;;  %v1737_v1 = vadd.f32 %v1736_v62, %v3789_v33 }
 0x3d1   : > { %v1738_v4 = vpop.f32.mrf.mxu1 }
 0x3d2   : > { %v1826_v2 = vadd.f32 %v1810_v63, %v3841_v10  ;;  %2867 = vpow2.f32 %v1793_v0  ;;  %1863 = vst [vmem:[%s3648_s11 + $0x60] sm:$0xff] %v1737_v1  ;;  %v1739_v5 = vadd.f32 %v1738_v4, %v3791_v35 }
 0x3d3   : > { %v2862_v6 = vpop.eup %2861  ;;  %v1740_v7 = vpop.f32.mrf.mxu1 }
 0x3d4   : > { %1890 = vst [vmem:[%s3652_s12 + $0x38] sm:$0xff] %v1826_v2  ;;  %v1811_v8 = vmul.f32 %v2862_v6, %v1763_v3  ;;  %v1795_v9 = vmul.f32 1.442695, %v1739_v5  ;;  %1879 = vst [vmem:[%s3650_s10 + $0x60] sm:$0xff] %v1739_v5  ;;  %v1741_v11 = vadd.f32 %v1740_v7, %v3789_v33 }
 0x3d5   : > { %v1742_v13 = vpop.f32.mrf.mxu1 }
 0x3d6   : > { %v1827_v10 = vadd.f32 %v1811_v8, %v3850_v19  ;;  %2869 = vpow2.f32 %v1795_v9  ;;  %1864 = vst [vmem:[%s3648_s11 + $0x68] sm:$0xff] %v1741_v11  ;;  %v1743_v14 = vadd.f32 %v1742_v13, %v3791_v35 }
 0x3d7   : > { %v2864_v15 = vpop.eup %2863  ;;  %v1746_v16 = vpop.f32.mrf.mxu1 }
 0x3d8   : > { %1891 = vst [vmem:[%s3652_s12 + $0x40] sm:$0xff] %v1827_v10  ;;  %v1812_v17 = vmul.f32 %v2864_v15, %v1764_v12  ;;  %v1797_v18 = vmul.f32 1.442695, %v1743_v14  ;;  %1880 = vst [vmem:[%s3650_s10 + $0x68] sm:$0xff] %v1743_v14  ;;  %v1747_v20 = vadd.f32 %v1746_v16, %v3789_v33 }
 0x3d9   : > { %v1748_v22 = vpop.f32.mrf.mxu1 }
 0x3da   : > { %v1828_v19 = vadd.f32 %v1812_v17, %v3861_v31  ;;  %2871 = vpow2.f32 %v1797_v18  ;;  %1865 = vst [vmem:[%s3648_s11 + $0x70] sm:$0xff] %v1747_v20  ;;  %v1749_v24 = vadd.f32 %v1748_v22, %v3791_v35 }
 0x3db   : > { %v2866_v25 = vpop.eup %2865  ;;  %v1750_v26 = vpop.f32.mrf.mxu1 }
 0x3dc   : > { %1892 = vst [vmem:[%s3652_s12 + $0x48] sm:$0xff] %v1828_v19  ;;  %v1813_v27 = vmul.f32 %v2866_v25, %v1765_v21  ;;  %v1799_v28 = vmul.f32 1.442695, %v1749_v24  ;;  %1881 = vst [vmem:[%s3650_s10 + $0x70] sm:$0xff] %v1749_v24  ;;  %v1751_v29 = vadd.f32 %v1750_v26, %v3789_v33 }
 0x3dd   : > { %v1752_v32 = vpop.f32.mrf.mxu1 }
 0x3de   : > { %v1829_v31 = vadd.f32 %v1813_v27, %v3873_v45  ;;  %2873 = vpow2.f32 %v1799_v28  ;;  %1866 = vst [vmem:[%s3648_s11 + $0x78] sm:$0xff] %v1751_v29  ;;  %v1753_v23 = vadd.f32 %v1752_v32, %v3791_v35 }
 0x3df   : > { %v2868_v36 = vpop.eup %2867 }
 0x3e0   : > { %1893 = vst [vmem:[%s3652_s12 + $0x50] sm:$0xff] %v1829_v31  ;;  %v1814_v34 = vmul.f32 %v2868_v36, %v1766_v30  ;;  %v1801_v37 = vmul.f32 1.442695, %v1753_v23  ;;  %1882 = vst [vmem:[%s3650_s10 + $0x78] sm:$0xff] %v1753_v23 }
 0x3e2   : > { %v1830_v33 = vadd.f32 %v1814_v34, %v3885_v56  ;;  %2875 = vpow2.f32 %v1801_v37 }
 0x3e3   : > { %v2870_v39 = vpop.eup %2869 }
 0x3e4   : > { %1894 = vst [vmem:[%s3652_s12 + $0x58] sm:$0xff] %v1830_v33  ;;  %v1815_v40 = vmul.f32 %v2870_v39, %v1767_v38 }
 0x3e6   : > { %v1831_v42 = vadd.f32 %v1815_v40, %v1737_v1 }
 0x3e7   : > { %v2872_v35 = vpop.eup %2871 }
 0x3e8   : > { %1895 = vst [vmem:[%s3652_s12 + $0x60] sm:$0xff] %v1831_v42  ;;  %v1816_v43 = vmul.f32 %v2872_v35, %v1768_v41 }
 0x3ea   : > { %v1832_v45 = vadd.f32 %v1816_v43, %v1741_v11 }
 0x3eb   : > { %v2874_v46 = vpop.eup %2873 }
 0x3ec   : > { %1896 = vst [vmem:[%s3652_s12 + $0x68] sm:$0xff] %v1832_v45  ;;  %v1817_v47 = vmul.f32 %v2874_v46, %v1769_v44 }
 0x3ee   : > { %v1833_v50 = vadd.f32 %v1817_v47, %v1747_v20 }
 0x3ef   : > { %v2876_v48 = vpop.eup %2875 }
 0x3f0   : > { %1897 = vst [vmem:[%s3652_s12 + $0x70] sm:$0xff] %v1833_v50  ;;  %v1818_v51 = vmul.f32 %v2876_v48, %v1770_v49 }
 0x3f2   : > { %v1834_v52 = vadd.f32 %v1818_v51, %v1751_v29 }
 0x3f4   : > { %1898 = vst [vmem:[%s3652_s12 + $0x78] sm:$0xff] %v1834_v52 }
 0x3f5 PF: > { %s4231_s0 = sld [smem:[#allocation30_spill]]  ;;  %s1944_s16 = sshll.u32 %s3648_s11, 4  ;;  %s3943_s16 = int_to_ptr.vmem [resolvable:$true] %s1944_s16 }
 0x3f6   : > { %s4232_s20 = sld [smem:[#allocation47_spill]]  ;;  %s3013_s26 = scalar_lea.vmem %s3943_s16, 2048 }
 0x3f7   : > { %p3014_p11 = scmp.ne.s32.totalorder %s3943_s16, %s3013_s26  ;;  %p4234_p13 = scmp.ne.s32.totalorder %s4210_s8, 0 }
 0x3f8   : > { %s3275_s17 = smov [#allocation13]  }
 0x3f9   : > { %p3015_p6 = pnand %p3014_p11, %p4234_p13 }
 0x3fb   : > { %s3934_s24 = sshll.u32 %s4231_s0, 11  ;;  %p3016_p1 = pneg %p3015_p6 }
 0x3fc   : > { %s4233_s13 = smov %s4232_s20  ;;  %s3940_s23 = scalar_lea.hbm %s4232_s20, %s3934_s24 }
 0x3fd   : > { %s3017_s0 = sshll.u32 %s3275_s17, 4  ;;  %s3018_s0 = int_to_ptr.vmem [resolvable:$false] %s3017_s0 }
 0x3fe   : > { %s3019_s1 = scalar_lea.vmem %s3018_s0, 4096  ;;  %p3020_p8 = scmp.lt.s32.totalorder %s3943_s16, %s3018_s0 }
 0x3ff   : > { %p3021_p7 = scmp.lt.s32.totalorder %s3019_s1, %s3013_s26 }
 0x401   : > { %p3022_p9 = por %p3021_p7, %p3020_p8 }
 0x403   : > { %p3023_p4 = pnand %p3022_p9, %p3016_p1 }
 0x405   : > { %3026 = shalt.err (!%p3023_p4)
}
 0x406   : > { %s3027_s11 = scalar_lea.hbm %s3940_s23, 2048  ;;  %s3031_s20 = scalar_lea.hbm %s4233_s13, 4096 }
 0x407   : > { %p3028_p3 = scmp.ne.s32.totalorder %s3940_s23, %s3027_s11  ;;  %p3032_p5 = scmp.lt.s32.totalorder %s3940_s23, %s4233_s13 }
 0x408   : > { %p3033_p12 = scmp.lt.s32.totalorder %s3031_s20, %s3027_s11 }
 0x409   : > { %p3029_p0 = pnand %p3028_p3, %p4234_p13 }
 0x40a   : > { %p3034_p2 = por %p3033_p12, %p3032_p5 }
 0x40b   : > { %p3030_p10 = pneg %p3029_p0 }
 0x40d   : > { %p3035_p11 = pnand %p3034_p2, %p3030_p10 }
 0x40f   : > { %3038 = shalt.err (!%p3035_p11)
}
 0x410   : > { %s3276_s1 = smov 128   ;;  %s3277_s26 = smov 8  }
 0x411   : > { %s4235_s4 = scalar_lea.sflag [#allocation14], %s3610_s3  ;;  %s4236_s7 = sld [smem:[#allocation46_spill]] }
 0x412   : > { %2565 = dma.vmem_to_hbm [thread:$0]  (%p4234_p13), %s3943_s16, 2048, %s3940_s23, %s4235_s4, %s3276_s1, %s3276_s1, %s3277_s26  }
 0x413   : > { %s1928_s20 = sshll.u32 %s3646_s27, 4  ;;  %s4237_s13 = sld [smem:[#allocation48_spill]]  ;;  %s3978_s20 = int_to_ptr.vmem [resolvable:$true] %s1928_s20 }
 0x414   : > { %s1900_s28 = scalar_lea.sflag [#allocation5], %s3637_s18  ;;  %s3039_s2 = scalar_lea.vmem %s3978_s20, 2048 }
 0x415   : > { %p3040_p6 = scmp.ne.s32.totalorder %s3978_s20, %s3039_s2  ;;  %s3278_s23 = smov [#allocation12]  }
 0x416   : > { %s3043_s16 = sshll.u32 %s3278_s23, 4  ;;  %s3044_s16 = int_to_ptr.vmem [resolvable:$false] %s3043_s16 }
 0x417   : > { %s3975_s6 = scalar_lea.hbm %s4236_s7, %s3934_s24  ;;  %p3041_p1 = pnand %p3040_p6, %p4234_p13 }
 0x418   : > { %s3045_s27 = scalar_lea.vmem %s3044_s16, 4096  ;;  %p3046_p7 = scmp.lt.s32.totalorder %s3978_s20, %s3044_s16 }
 0x419   : > { %s3984_s29 = scalar_lea.hbm %s4237_s13, %s3934_s24  ;;  %p3042_p8 = pneg %p3041_p1 }
 0x41a   : > { %p3047_p9 = scmp.lt.s32.totalorder %s3045_s27, %s3039_s2 }
 0x41c   : > { %p3048_p4 = por %p3047_p9, %p3046_p7 }
 0x41e   : > { %p3049_p3 = pnand %p3048_p4, %p3042_p8 }
 0x420   : > { %3052 = shalt.err (!%p3049_p3)
}
 0x421   : > { %s3053_s5 = scalar_lea.hbm %s3975_s6, 2048  ;;  %s3057_s11 = scalar_lea.hbm %s4236_s7, 4096 }
 0x422   : > { %p3054_p0 = scmp.ne.s32.totalorder %s3975_s6, %s3053_s5  ;;  %p3058_p12 = scmp.lt.s32.totalorder %s3975_s6, %s4236_s7 }
 0x423   : > { %p3059_p2 = scmp.lt.s32.totalorder %s3057_s11, %s3053_s5 }
 0x424   : > { %p3055_p10 = pnand %p3054_p0, %p4234_p13 }
 0x425   : > { %p3060_p11 = por %p3059_p2, %p3058_p12 }
 0x426   : > { %p3056_p5 = pneg %p3055_p10 }
 0x428   : > { %p3061_p6 = pnand %p3060_p11, %p3056_p5 }
 0x42a   : > { %3064 = shalt.err (!%p3061_p6)
}
 0x42b   : > { %2564 = dma.vmem_to_hbm [thread:$0]  (%p4234_p13), %s3978_s20, 2048, %s3975_s6, %s1900_s28, %s3276_s1, %s3276_s1, %s3277_s26  }
 0x42c   : > { %s1960_s2 = sshll.u32 %s3650_s10, 4  ;;  %s4238_s5 = sld [smem:[#allocation49_spill]]  ;;  %s4011_s2 = int_to_ptr.vmem [resolvable:$true] %s1960_s2 }
 0x42d   : > { %s3065_s0 = scalar_lea.vmem %s4011_s2, 2048  ;;  %s3279_s11 = smov [#allocation15]  }
 0x42e   : > { %p3066_p1 = scmp.ne.s32.totalorder %s4011_s2, %s3065_s0  ;;  %s3069_s17 = sshll.u32 %s3279_s11, 4  ;;  %s3070_s17 = int_to_ptr.vmem [resolvable:$false] %s3069_s17 }
 0x42f   : > { %s3071_s28 = scalar_lea.vmem %s3070_s17, 4096  ;;  %p3072_p9 = scmp.lt.s32.totalorder %s4011_s2, %s3070_s17 }
 0x430   : > { %p3067_p8 = pnand %p3066_p1, %p4234_p13  ;;  %p3073_p4 = scmp.lt.s32.totalorder %s3071_s28, %s3065_s0 }
 0x432   : > { %s4017_s4 = scalar_lea.hbm %s4238_s5, %s3934_s24  ;;  %p3068_p7 = pneg %p3067_p8 }
 0x433   : > { %p3074_p3 = por %p3073_p4, %p3072_p9 }
 0x435   : > { %p3075_p0 = pnand %p3074_p3, %p3068_p7 }
 0x437   : > { %3078 = shalt.err (!%p3075_p0)
}
 0x438   : > { %s3079_s10 = scalar_lea.hbm %s3984_s29, 2048  ;;  %s3083_s20 = scalar_lea.hbm %s4237_s13, 4096 }
 0x439   : > { %p3080_p10 = scmp.ne.s32.totalorder %s3984_s29, %s3079_s10  ;;  %p3084_p2 = scmp.lt.s32.totalorder %s3984_s29, %s4237_s13 }
 0x43a   : > { %p3085_p11 = scmp.lt.s32.totalorder %s3083_s20, %s3079_s10 }
 0x43b   : > { %p3081_p5 = pnand %p3080_p10, %p4234_p13 }
 0x43c   : > { %p3086_p6 = por %p3085_p11, %p3084_p2 }
 0x43d   : > { %p3082_p12 = pneg %p3081_p5 }
 0x43f   : > { %p3087_p1 = pnand %p3086_p6, %p3082_p12 }
 0x441   : > { %3090 = shalt.err (!%p3087_p1)
}
 0x442   : > { %s4239_s27 = scalar_lea.sflag [#allocation14], %s3610_s3  ;;  %s1976_s0 = sshll.u32 %s3652_s12, 4  ;;  %s4045_s0 = int_to_ptr.vmem [resolvable:$true] %s1976_s0 }
 0x443   : > { %2566 = dma.vmem_to_hbm [thread:$0]  (%p4234_p13), %s4011_s2, 2048, %s3984_s29, %s4239_s27, %s3276_s1, %s3276_s1, %s3277_s26  }
 0x444   : > { %s1915_s11 = scalar_lea.sflag [#allocation17], %s3637_s18  ;;  %s3091_s17 = scalar_lea.vmem %s4045_s0, 2048 }
 0x445   : > { %p3092_p8 = scmp.ne.s32.totalorder %s4045_s0, %s3091_s17  ;;  %s3280_s28 = smov [#allocation16]  }
 0x446   : > { %s3095_s3 = sshll.u32 %s3280_s28, 4  ;;  %s3096_s3 = int_to_ptr.vmem [resolvable:$false] %s3095_s3 }
 0x447   : > { %p3093_p7 = pnand %p3092_p8, %p4234_p13  ;;  %s3097_s10 = scalar_lea.vmem %s3096_s3, 4096 }
 0x448   : > { %p3098_p4 = scmp.lt.s32.totalorder %s4045_s0, %s3096_s3  ;;  %p3099_p3 = scmp.lt.s32.totalorder %s3097_s10, %s3091_s17 }
 0x449   : > { %p3094_p9 = pneg %p3093_p7 }
 0x44a   : > { %p3100_p0 = por %p3099_p3, %p3098_p4 }
 0x44c   : > { %p3101_p10 = pnand %p3100_p0, %p3094_p9 }
 0x44e   : > { %3104 = shalt.err (!%p3101_p10)
}
 0x44f   : > { %s3105_s29 = scalar_lea.hbm %s4017_s4, 2048  ;;  %s3109_s2 = scalar_lea.hbm %s4238_s5, 4096 }
 0x450   : > { %p3106_p5 = scmp.ne.s32.totalorder %s4017_s4, %s3105_s29  ;;  %p3110_p11 = scmp.lt.s32.totalorder %s4017_s4, %s4238_s5 }
 0x451   : > { %p3111_p6 = scmp.lt.s32.totalorder %s3109_s2, %s3105_s29 }
 0x452   : > { %p3107_p12 = pnand %p3106_p5, %p4234_p13 }
 0x453   : > { %p3112_p1 = por %p3111_p6, %p3110_p11 }
 0x454   : > { %p3108_p2 = pneg %p3107_p12 }
 0x456   : > { %p3113_p8 = pnand %p3112_p1, %p3108_p2 }
 0x458   : > { %3116 = shalt.err (!%p3113_p8)
}
 0x459   : > { %2567 = dma.vmem_to_hbm [thread:$0]  (%p4234_p13), %s4045_s0, 2048, %s4017_s4, %s1915_s11, %s3276_s1, %s3276_s1, %s3277_s26  }
 0x45a PF: > { %s4240_s20 = sld [smem:[#allocation26_spill]]  ;;  %p2607_p7 = scmp.ge.s32.totalorder %s3259_s30, 2 }
 0x45b   : > { %p4241_p9 = scmp.ne.s32.totalorder %s4211_s14, 0 }
 0x45d   : > { %p2590_p4 = pnand %p2607_p7, %p4241_p9 }
 0x45f   : > { %p2591_p3 = pneg %p2590_p4 }
 0x460   : > { %s1991_s23 = sand.u32 1, %s4240_s20  }
 0x461   : > { %s1992_s16 = scalar_lea.sflag [#allocation5], %s1991_s23 }
 0x462   : > { %3194 = dma.done.wait (%p2591_p3), %s1992_s16, 2048  }
 0x463   : > { %3196 = vsyncadd (%p2591_p3), %s1992_s16, 4294965248  ;;  %s4242_s8 = sadd.s32 4294967294, %s3259_s30  }
 0x464   : > { %s2000_s27 = sand.u32 1, %s4242_s8  }
 0x465   : > { %s2001_s17 = scalar_lea.sflag [#allocation14], %s2000_s27 }
 0x466   : > { %3198 = dma.done.wait (%p2591_p3), %s2001_s17, 4096  }
 0x467   : > { %3200 = vsyncadd (%p2591_p3), %s2001_s17, 4294963200  ;;  %s2019_s28 = scalar_lea.sflag [#allocation17], %s1991_s23 }
 0x468   : > { %3202 = dma.done.wait (%p2591_p3), %s2019_s28, 2048  }
 0x469   : > { %3204 = vsyncadd (%p2591_p3), %s2019_s28, 4294965248  ;;  %s38_s30 = sadd.s32 1, %s3259_s30   ;;  %s4244_s17 = sld [smem:[#allocation27_spill]] }
 0x46a   : > { %p4078_p13 = scmp.ge.s32.totalorder %s38_s30, 10   ;;  %s4245_s23 = sld [smem:[#allocation28_spill]] }
 0x46b   : > { %s4246_s14 = sld [smem:[#allocation37_spill]]  ;;  %s4251_s18 = smov %s3215_s19 }
 0x46c   : > { %s4247_s26 = sld [smem:[#allocation31_spill]]  ;;  %s4252_s19 = smov %s3562_s15 }
 0x46d   : > { %s4248_s27 = sld [smem:[#allocation32_spill]]  ;;  %s4253_s20 = smov %s3223_s21 }
 0x46e   : > { %s4249_s28 = sld [smem:[#allocation34_spill]]  ;;  %s4254_s21 = smov %s3227_s22 }
 0x46f   : > { %s4250_s29 = sld [smem:[#allocation35_spill]]  ;;  %s4255_s22 = smov %s3523_s9 }
 0x470   : > { %s4256_s24 = smov %s3239_s25  ;;  %37 = sbr.rel (!%p4078_p13) target bundleno = 30 (0x1e), region = 186 }
 0x471   : > { %s4257_s25 = smov %s4246_s14 }
 0x475   :  { %2024 = vsyncpa [#allocation4], 1 }
 0x476   :  { %2026 = vsyncpa [#allocation4 + $0x1], 1 }
 0x477   :  { %2027 = vsyncpa [#allocation7], 1 }
 0x478   :  { %2029 = vsyncpa [#allocation7 + $0x1], 1 }
 0x479   :  { %2030 = vsyncpa [#allocation10], 1 }
 0x47a   :  { %2031 = vsyncpa [#allocation5], 1 }
 0x47b   :  { %2033 = vsyncpa [#allocation5 + $0x1], 1 }
 0x47c   :  { %2034 = vsyncpa [#allocation14], 1 }
 0x47d   :  { %2036 = vsyncpa [#allocation14 + $0x1], 1 }
 0x47e   :  { %2037 = vsyncpa [#allocation17], 1 }
 0x47f   :  { %2039 = vsyncpa [#allocation17 + $0x1], 1 }

</bundles_post_ra>
